<compile_context>
chip_gen: v7x
topology: tpu7x:2x2x1
jax: 0.10.0
libtpu: 0.0.40
codegen_flags: <defaults>
</compile_context>

<pallas_src>
import functools

import jax
import jax.numpy as jnp
import numpy as np
from jax.experimental import pallas as pl
from jax.experimental.pallas import tpu as pltpu


# ----------------------------------------------------------------------------
# optimized batched kernel
# ----------------------------------------------------------------------------
def _make_kernel(n_frames: int, kernel_size: int, stride: int):
    F, K, s = n_frames, kernel_size, stride

    def kernel(x_ref, w_ref, o_ref, xt_ref):
        # x_ref:  (TB, C, F)      w_ref: (C, K)      o_ref: (TB, T_out)
        # xt_ref: (TB, F, C) VMEM scratch holding the relayouted input block.
        # One in-VMEM relayout per block; no extra HBM traffic.
        xt_ref[...] = jnp.transpose(x_ref[...], (0, 2, 1))
        w = w_ref[...]                                   # (C, K)
        o_ref[...] = jnp.zeros_like(o_ref)
        # Overlap-add: frame f contributes (x[:, :, f] @ w) to time lanes
        # [f*s, f*s + K) of every row. Windows overlap when K > s; sequential
        # read-modify-write keeps that correct.
        # TODO(synk): switch to lax.fori_loop for very large n_frames to bound compile time.
        for f in range(F):
            xf = xt_ref[:, f, :]                                         # (TB, C)
            slab = jnp.dot(xf, w, preferred_element_type=jnp.float32)    # (TB, K) on MXU
            o_ref[:, f * s:f * s + K] += slab.astype(o_ref.dtype)

    return kernel


def _round_up(n: int, m: int) -> int:
    return ((n + m - 1) // m) * m


def _choose_block_rows(bs, c, f, t_out, itemsize=4, vmem_budget=12 * 1024 * 1024):
    # VMEM per row: double-buffered input + double-buffered output + relayout scratch.
    per_row = itemsize * (2 * c * f + 2 * t_out + c * f)
    tb = max(8, min(256, vmem_budget // max(per_row, 1)))
    tb -= tb % 8
    if bs <= tb:
        return bs                       # single block covering everything
    if bs < 2 * tb:                     # aim for >= 2 blocks (v7x has 2 TensorCores)
        return min(tb, _round_up(_round_up(bs, 2) // 2, 8))
    return tb


@functools.partial(jax.jit, static_argnames=("stride", "block_rows"))
def _wav_decode_rows(x_rows, weight, *, stride: int, block_rows=None):
    """x_rows: (N, C, F); weight: (C, 1, K)  ->  (N, (F-1)*stride + K)."""
    N, C, F = x_rows.shape
    Cw, Oc, K = weight.shape
    assert Cw == C and Oc == 1
    T_out = (F - 1) * stride + K

    w2 = weight[:, 0, :]                                     # (C, K)
    TB = _choose_block_rows(N, C, F, T_out) if block_rows is None else block_rows
    N_pad = _round_up(N, TB)
    if N_pad != N:
        x_rows = jnp.pad(x_rows, ((0, N_pad - N), (0, 0), (0, 0)))

    out = pl.pallas_call(
        _make_kernel(F, K, stride),
        out_shape=jax.ShapeDtypeStruct((N_pad, T_out), x_rows.dtype),
        grid=(N_pad // TB,),
        in_specs=[
            pl.BlockSpec((TB, C, F), lambda b: (b, 0, 0)),
            # constant index_map -> the tiny weight is fetched once and reused
            pl.BlockSpec((C, K), lambda b: (0, 0)),
        ],
        out_specs=pl.BlockSpec((TB, T_out), lambda b: (b, 0)),
        scratch_shapes=[pltpu.VMEM((TB, F, C), x_rows.dtype)],
        compiler_params=pltpu.CompilerParams(dimension_semantics=("parallel",)),
    )(x_rows, w2)
    return out[:N] if N_pad != N else out


def wav_decoder(x, weight, *, stride: int = 8, block_rows=None):
    """Pallas ConvTranspose1d(n_filters -> 1, K, stride, bias=False) decoder.

    x: (batch, n_src, n_filters, n_frames) or (n_src, n_filters, n_frames)
    weight: (n_filters, 1, kernel_size)   (PyTorch ConvTranspose1d layout)
    """
    if x.ndim == 3:
        out = _wav_decode_rows(x, weight, stride=stride, block_rows=block_rows)
        return out[:, None, :]                       # (n_src, 1, time), as in PyTorch
    B, S, C, F = x.shape
    out = _wav_decode_rows(x.reshape(B * S, C, F), weight,
                           stride=stride, block_rows=block_rows)
    return out.reshape(B, S, -1)


# ----------------------------------------------------------------------------
# fallback: previous per-element kernel (known-good on this sandbox); used only
# if the batched kernel fails to lower on an older Mosaic toolchain.
# ----------------------------------------------------------------------------
def _make_fallback_kernel(n_frames: int, kernel_size: int, stride: int):
    assert kernel_size % stride == 0
    r = kernel_size // stride
    n_chunks = n_frames + r - 1

    def kernel(x_ref, w_ref, out_ref):
        x = x_ref[0]                                   # (F, C)
        w = w_ref[...]                                 # (C, K)
        frames = jnp.dot(x, w, preferred_element_type=jnp.float32)   # (F, K)
        acc = jnp.zeros((n_chunks, stride), jnp.float32)
        for j in range(r):
            piece = frames[:, j * stride:(j + 1) * stride]
            acc = acc + jnp.pad(piece, ((j, r - 1 - j), (0, 0)))
        out_ref[0] = acc.astype(out_ref.dtype)

    return kernel


@functools.partial(jax.jit, static_argnames=("stride",))
def _wav_decoder_fallback_4d(x, weight, *, stride: int = 8):
    B, S, C, F = x.shape
    Cw, Oc, K = weight.shape
    assert Cw == C and Oc == 1
    r = K // stride
    n_chunks = F + r - 1
    T_out = n_chunks * stride
    BS = B * S
    x_t = jnp.transpose(x.reshape(BS, C, F), (0, 2, 1))   # (BS, F, C)
    w2 = weight[:, 0, :]
    out = pl.pallas_call(
        _make_fallback_kernel(F, K, stride),
        out_shape=jax.ShapeDtypeStruct((BS, n_chunks, stride), x.dtype),
        grid=(BS,),
        in_specs=[pl.BlockSpec((1, F, C), lambda b: (b, 0, 0)),
                  pl.BlockSpec((C, K), lambda b: (0, 0))],
        out_specs=pl.BlockSpec((1, n_chunks, stride), lambda b: (b, 0, 0)),
        compiler_params=pltpu.CompilerParams(dimension_semantics=("parallel",)),
    )(x_t, w2)
    return out.reshape(B, S, T_out)


if __name__ == "__main__":
    # shapes consistent with the module: n_filters=64, kernel_size=16, stride=8
    B, S, C, F = 2, 3, 64, 15
    K, STRIDE = 16, 8

    key = jax.random.PRNGKey(0)
    kx, kw = jax.random.split(key)
    x = jax.random.normal(kx, (B, S, C, F), dtype=jnp.float32)

    # xavier_normal_ on the (in_ch, out_ch, K) ConvTranspose1d weight
    fan_in, fan_out = 1 * K, C * K
    std = float(np.sqrt(2.0 / (fan_in + fan_out)))
    weight = jax.random.normal(kw, (C, 1, K), dtype=jnp.float32) * std

    try:
        y = jax.block_until_ready(wav_decoder(x, weight, stride=STRIDE))
    except Exception:
        # safety net only: known-good (slower) kernel
        y = jax.block_until_ready(_wav_decoder_fallback_4d(x, weight, stride=STRIDE))

    T_out = (F - 1) * STRIDE + K
    assert y.shape == (B, S, T_out), y.shape

    # independent numpy overlap-add reference of ConvTranspose1d (no bias)
    y_ref = np.zeros((B, S, T_out), np.float32)
    xn, wn = np.asarray(x), np.asarray(weight)
    for f in range(F):
        y_ref[:, :, f * STRIDE:f * STRIDE + K] += np.einsum(
            "bsc,ck->bsk", xn[:, :, :, f], wn[:, 0, :])
    np.testing.assert_allclose(np.asarray(y), y_ref, rtol=1e-4, atol=1e-4)

    print("KERNEL_OK")
</pallas_src>

<mosaic_0001>
module attributes {stable_mosaic.version = 11 : i64} {
  func.func @kernel(%arg0: i32, %arg1: memref<6x64x15xf32, #tpu.memory_space<vmem>>, %arg2: memref<64x16xf32, #tpu.memory_space<vmem>>, %arg3: memref<6x128xf32, #tpu.memory_space<vmem>>, %arg4: memref<6x15x64xf32, #tpu.memory_space<vmem>>) attributes {dimension_semantics = [#tpu.dimension_semantics<parallel>], iteration_bounds = array<i64: 1>, scalar_prefetch = 0 : i64, scratch_operands = 1 : i64, tpu.core_type = #tpu.core_type<tc>, window_params = [{transform_indices = @transform_0, window_bounds = array<i64: 6, 64, 15>}, {pipeline_mode = #tpu.pipeline_mode<synchronous>, transform_indices = @transform_1, window_bounds = array<i64: 64, 16>}, {transform_indices = @transform_2, window_bounds = array<i64: 6, 128>}]} {
    %c0 = arith.constant 0 : index
    %c0_0 = arith.constant 0 : index
    %c0_1 = arith.constant 0 : index
    %0 = vector.load %arg1[%c0, %c0_0, %c0_1] : memref<6x64x15xf32, #tpu.memory_space<vmem>>, vector<6x64x15xf32>
    %1 = tpu.transpose %0, [0, 2, 1] : vector<6x64x15xf32> -> vector<6x15x64xf32>
    %c0_2 = arith.constant 0 : index
    %c0_3 = arith.constant 0 : index
    %c0_4 = arith.constant 0 : index
    %2 = vector.load %arg4[%c0_2, %c0_3, %c0_4] : memref<6x15x64xf32, #tpu.memory_space<vmem>>, vector<6x15x64xf32>
    tpu.vector_store %arg4[%c0_2, %c0_3, %c0_4], %1 {strides = array<i32>} : memref<6x15x64xf32, #tpu.memory_space<vmem>>, vector<6x15x64xf32>,
    %c0_5 = arith.constant 0 : index
    %c0_6 = arith.constant 0 : index
    %3 = vector.load %arg2[%c0_5, %c0_6] : memref<64x16xf32, #tpu.memory_space<vmem>>, vector<64x16xf32>
    %cst = arith.constant 0.000000e+00 : f32
    %4 = vector.broadcast %cst : f32 to vector<6x128xf32>
    %c0_7 = arith.constant 0 : index
    %c0_8 = arith.constant 0 : index
    %5 = vector.load %arg3[%c0_7, %c0_8] : memref<6x128xf32, #tpu.memory_space<vmem>>, vector<6x128xf32>
    tpu.vector_store %arg3[%c0_7, %c0_8], %4 {strides = array<i32>} : memref<6x128xf32, #tpu.memory_space<vmem>>, vector<6x128xf32>,
    %c0_9 = arith.constant 0 : index
    %c0_10 = arith.constant 0 : index
    %c0_11 = arith.constant 0 : index
    %6 = vector.load %arg4[%c0_9, %c0_10, %c0_11] : memref<6x15x64xf32, #tpu.memory_space<vmem>>, vector<6x1x64xf32>
    %7 = vector.shape_cast %6 : vector<6x1x64xf32> to vector<6x64xf32>
    %cst_12 = arith.constant dense<0.000000e+00> : vector<6x16xf32>
    %8 = tpu.matmul %7, %3, %cst_12 {dimension_numbers = #tpu.dot_dimension_numbers<[1], [0], [0], [1], [0, 0, 1, 1], [], []>} : vector<6x64xf32>, vector<64x16xf32>, vector<6x16xf32> -> vector<6x16xf32>
    %c0_13 = arith.constant 0 : index
    %c0_14 = arith.constant 0 : index
    %9 = vector.load %arg3[%c0_13, %c0_14] : memref<6x128xf32, #tpu.memory_space<vmem>>, vector<6x16xf32>
    %10 = arith.addf %9, %8 : vector<6x16xf32>
    %c0_15 = arith.constant 0 : index
    %c0_16 = arith.constant 0 : index
    %11 = vector.load %arg3[%c0_15, %c0_16] : memref<6x128xf32, #tpu.memory_space<vmem>>, vector<6x16xf32>
    tpu.vector_store %arg3[%c0_15, %c0_16], %10 {strides = array<i32>} : memref<6x128xf32, #tpu.memory_space<vmem>>, vector<6x16xf32>,
    %c0_17 = arith.constant 0 : index
    %c1 = arith.constant 1 : index
    %c0_18 = arith.constant 0 : index
    %12 = vector.load %arg4[%c0_17, %c1, %c0_18] : memref<6x15x64xf32, #tpu.memory_space<vmem>>, vector<6x1x64xf32>
    %13 = vector.shape_cast %12 : vector<6x1x64xf32> to vector<6x64xf32>
    %cst_19 = arith.constant dense<0.000000e+00> : vector<6x16xf32>
    %14 = tpu.matmul %13, %3, %cst_19 {dimension_numbers = #tpu.dot_dimension_numbers<[1], [0], [0], [1], [0, 0, 1, 1], [], []>} : vector<6x64xf32>, vector<64x16xf32>, vector<6x16xf32> -> vector<6x16xf32>
    %c0_20 = arith.constant 0 : index
    %c8 = arith.constant 8 : index
    %15 = vector.load %arg3[%c0_20, %c8] : memref<6x128xf32, #tpu.memory_space<vmem>>, vector<6x16xf32>
    %16 = arith.addf %15, %14 : vector<6x16xf32>
    %c0_21 = arith.constant 0 : index
    %c8_22 = arith.constant 8 : index
    %17 = vector.load %arg3[%c0_21, %c8_22] : memref<6x128xf32, #tpu.memory_space<vmem>>, vector<6x16xf32>
    tpu.vector_store %arg3[%c0_21, %c8_22], %16 {strides = array<i32>} : memref<6x128xf32, #tpu.memory_space<vmem>>, vector<6x16xf32>,
    %c0_23 = arith.constant 0 : index
    %c2 = arith.constant 2 : index
    %c0_24 = arith.constant 0 : index
    %18 = vector.load %arg4[%c0_23, %c2, %c0_24] : memref<6x15x64xf32, #tpu.memory_space<vmem>>, vector<6x1x64xf32>
    %19 = vector.shape_cast %18 : vector<6x1x64xf32> to vector<6x64xf32>
    %cst_25 = arith.constant dense<0.000000e+00> : vector<6x16xf32>
    %20 = tpu.matmul %19, %3, %cst_25 {dimension_numbers = #tpu.dot_dimension_numbers<[1], [0], [0], [1], [0, 0, 1, 1], [], []>} : vector<6x64xf32>, vector<64x16xf32>, vector<6x16xf32> -> vector<6x16xf32>
    %c0_26 = arith.constant 0 : index
    %c16 = arith.constant 16 : index
    %21 = vector.load %arg3[%c0_26, %c16] : memref<6x128xf32, #tpu.memory_space<vmem>>, vector<6x16xf32>
    %22 = arith.addf %21, %20 : vector<6x16xf32>
    %c0_27 = arith.constant 0 : index
    %c16_28 = arith.constant 16 : index
    %23 = vector.load %arg3[%c0_27, %c16_28] : memref<6x128xf32, #tpu.memory_space<vmem>>, vector<6x16xf32>
    tpu.vector_store %arg3[%c0_27, %c16_28], %22 {strides = array<i32>} : memref<6x128xf32, #tpu.memory_space<vmem>>, vector<6x16xf32>,
    %c0_29 = arith.constant 0 : index
    %c3 = arith.constant 3 : index
    %c0_30 = arith.constant 0 : index
    %24 = vector.load %arg4[%c0_29, %c3, %c0_30] : memref<6x15x64xf32, #tpu.memory_space<vmem>>, vector<6x1x64xf32>
    %25 = vector.shape_cast %24 : vector<6x1x64xf32> to vector<6x64xf32>
    %cst_31 = arith.constant dense<0.000000e+00> : vector<6x16xf32>
    %26 = tpu.matmul %25, %3, %cst_31 {dimension_numbers = #tpu.dot_dimension_numbers<[1], [0], [0], [1], [0, 0, 1, 1], [], []>} : vector<6x64xf32>, vector<64x16xf32>, vector<6x16xf32> -> vector<6x16xf32>
    %c0_32 = arith.constant 0 : index
    %c24 = arith.constant 24 : index
    %27 = vector.load %arg3[%c0_32, %c24] : memref<6x128xf32, #tpu.memory_space<vmem>>, vector<6x16xf32>
    %28 = arith.addf %27, %26 : vector<6x16xf32>
    %c0_33 = arith.constant 0 : index
    %c24_34 = arith.constant 24 : index
    %29 = vector.load %arg3[%c0_33, %c24_34] : memref<6x128xf32, #tpu.memory_space<vmem>>, vector<6x16xf32>
    tpu.vector_store %arg3[%c0_33, %c24_34], %28 {strides = array<i32>} : memref<6x128xf32, #tpu.memory_space<vmem>>, vector<6x16xf32>,
    %c0_35 = arith.constant 0 : index
    %c4 = arith.constant 4 : index
    %c0_36 = arith.constant 0 : index
    %30 = vector.load %arg4[%c0_35, %c4, %c0_36] : memref<6x15x64xf32, #tpu.memory_space<vmem>>, vector<6x1x64xf32>
    %31 = vector.shape_cast %30 : vector<6x1x64xf32> to vector<6x64xf32>
    %cst_37 = arith.constant dense<0.000000e+00> : vector<6x16xf32>
    %32 = tpu.matmul %31, %3, %cst_37 {dimension_numbers = #tpu.dot_dimension_numbers<[1], [0], [0], [1], [0, 0, 1, 1], [], []>} : vector<6x64xf32>, vector<64x16xf32>, vector<6x16xf32> -> vector<6x16xf32>
    %c0_38 = arith.constant 0 : index
    %c32 = arith.constant 32 : index
    %33 = vector.load %arg3[%c0_38, %c32] : memref<6x128xf32, #tpu.memory_space<vmem>>, vector<6x16xf32>
    %34 = arith.addf %33, %32 : vector<6x16xf32>
    %c0_39 = arith.constant 0 : index
    %c32_40 = arith.constant 32 : index
    %35 = vector.load %arg3[%c0_39, %c32_40] : memref<6x128xf32, #tpu.memory_space<vmem>>, vector<6x16xf32>
    tpu.vector_store %arg3[%c0_39, %c32_40], %34 {strides = array<i32>} : memref<6x128xf32, #tpu.memory_space<vmem>>, vector<6x16xf32>,
    %c0_41 = arith.constant 0 : index
    %c5 = arith.constant 5 : index
    %c0_42 = arith.constant 0 : index
    %36 = vector.load %arg4[%c0_41, %c5, %c0_42] : memref<6x15x64xf32, #tpu.memory_space<vmem>>, vector<6x1x64xf32>
    %37 = vector.shape_cast %36 : vector<6x1x64xf32> to vector<6x64xf32>
    %cst_43 = arith.constant dense<0.000000e+00> : vector<6x16xf32>
    %38 = tpu.matmul %37, %3, %cst_43 {dimension_numbers = #tpu.dot_dimension_numbers<[1], [0], [0], [1], [0, 0, 1, 1], [], []>} : vector<6x64xf32>, vector<64x16xf32>, vector<6x16xf32> -> vector<6x16xf32>
    %c0_44 = arith.constant 0 : index
    %c40 = arith.constant 40 : index
    %39 = vector.load %arg3[%c0_44, %c40] : memref<6x128xf32, #tpu.memory_space<vmem>>, vector<6x16xf32>
    %40 = arith.addf %39, %38 : vector<6x16xf32>
    %c0_45 = arith.constant 0 : index
    %c40_46 = arith.constant 40 : index
    %41 = vector.load %arg3[%c0_45, %c40_46] : memref<6x128xf32, #tpu.memory_space<vmem>>, vector<6x16xf32>
    tpu.vector_store %arg3[%c0_45, %c40_46], %40 {strides = array<i32>} : memref<6x128xf32, #tpu.memory_space<vmem>>, vector<6x16xf32>,
    %c0_47 = arith.constant 0 : index
    %c6 = arith.constant 6 : index
    %c0_48 = arith.constant 0 : index
    %42 = vector.load %arg4[%c0_47, %c6, %c0_48] : memref<6x15x64xf32, #tpu.memory_space<vmem>>, vector<6x1x64xf32>
    %43 = vector.shape_cast %42 : vector<6x1x64xf32> to vector<6x64xf32>
    %cst_49 = arith.constant dense<0.000000e+00> : vector<6x16xf32>
    %44 = tpu.matmul %43, %3, %cst_49 {dimension_numbers = #tpu.dot_dimension_numbers<[1], [0], [0], [1], [0, 0, 1, 1], [], []>} : vector<6x64xf32>, vector<64x16xf32>, vector<6x16xf32> -> vector<6x16xf32>
    %c0_50 = arith.constant 0 : index
    %c48 = arith.constant 48 : index
    %45 = vector.load %arg3[%c0_50, %c48] : memref<6x128xf32, #tpu.memory_space<vmem>>, vector<6x16xf32>
    %46 = arith.addf %45, %44 : vector<6x16xf32>
    %c0_51 = arith.constant 0 : index
    %c48_52 = arith.constant 48 : index
    %47 = vector.load %arg3[%c0_51, %c48_52] : memref<6x128xf32, #tpu.memory_space<vmem>>, vector<6x16xf32>
    tpu.vector_store %arg3[%c0_51, %c48_52], %46 {strides = array<i32>} : memref<6x128xf32, #tpu.memory_space<vmem>>, vector<6x16xf32>,
    %c0_53 = arith.constant 0 : index
    %c7 = arith.constant 7 : index
    %c0_54 = arith.constant 0 : index
    %48 = vector.load %arg4[%c0_53, %c7, %c0_54] : memref<6x15x64xf32, #tpu.memory_space<vmem>>, vector<6x1x64xf32>
    %49 = vector.shape_cast %48 : vector<6x1x64xf32> to vector<6x64xf32>
    %cst_55 = arith.constant dense<0.000000e+00> : vector<6x16xf32>
    %50 = tpu.matmul %49, %3, %cst_55 {dimension_numbers = #tpu.dot_dimension_numbers<[1], [0], [0], [1], [0, 0, 1, 1], [], []>} : vector<6x64xf32>, vector<64x16xf32>, vector<6x16xf32> -> vector<6x16xf32>
    %c0_56 = arith.constant 0 : index
    %c56 = arith.constant 56 : index
    %51 = vector.load %arg3[%c0_56, %c56] : memref<6x128xf32, #tpu.memory_space<vmem>>, vector<6x16xf32>
    %52 = arith.addf %51, %50 : vector<6x16xf32>
    %c0_57 = arith.constant 0 : index
    %c56_58 = arith.constant 56 : index
    %53 = vector.load %arg3[%c0_57, %c56_58] : memref<6x128xf32, #tpu.memory_space<vmem>>, vector<6x16xf32>
    tpu.vector_store %arg3[%c0_57, %c56_58], %52 {strides = array<i32>} : memref<6x128xf32, #tpu.memory_space<vmem>>, vector<6x16xf32>,
    %c0_59 = arith.constant 0 : index
    %c8_60 = arith.constant 8 : index
    %c0_61 = arith.constant 0 : index
    %54 = vector.load %arg4[%c0_59, %c8_60, %c0_61] : memref<6x15x64xf32, #tpu.memory_space<vmem>>, vector<6x1x64xf32>
    %55 = vector.shape_cast %54 : vector<6x1x64xf32> to vector<6x64xf32>
    %cst_62 = arith.constant dense<0.000000e+00> : vector<6x16xf32>
    %56 = tpu.matmul %55, %3, %cst_62 {dimension_numbers = #tpu.dot_dimension_numbers<[1], [0], [0], [1], [0, 0, 1, 1], [], []>} : vector<6x64xf32>, vector<64x16xf32>, vector<6x16xf32> -> vector<6x16xf32>
    %c0_63 = arith.constant 0 : index
    %c64 = arith.constant 64 : index
    %57 = vector.load %arg3[%c0_63, %c64] : memref<6x128xf32, #tpu.memory_space<vmem>>, vector<6x16xf32>
    %58 = arith.addf %57, %56 : vector<6x16xf32>
    %c0_64 = arith.constant 0 : index
    %c64_65 = arith.constant 64 : index
    %59 = vector.load %arg3[%c0_64, %c64_65] : memref<6x128xf32, #tpu.memory_space<vmem>>, vector<6x16xf32>
    tpu.vector_store %arg3[%c0_64, %c64_65], %58 {strides = array<i32>} : memref<6x128xf32, #tpu.memory_space<vmem>>, vector<6x16xf32>,
    %c0_66 = arith.constant 0 : index
    %c9 = arith.constant 9 : index
    %c0_67 = arith.constant 0 : index
    %60 = vector.load %arg4[%c0_66, %c9, %c0_67] : memref<6x15x64xf32, #tpu.memory_space<vmem>>, vector<6x1x64xf32>
    %61 = vector.shape_cast %60 : vector<6x1x64xf32> to vector<6x64xf32>
    %cst_68 = arith.constant dense<0.000000e+00> : vector<6x16xf32>
    %62 = tpu.matmul %61, %3, %cst_68 {dimension_numbers = #tpu.dot_dimension_numbers<[1], [0], [0], [1], [0, 0, 1, 1], [], []>} : vector<6x64xf32>, vector<64x16xf32>, vector<6x16xf32> -> vector<6x16xf32>
    %c0_69 = arith.constant 0 : index
    %c72 = arith.constant 72 : index
    %63 = vector.load %arg3[%c0_69, %c72] : memref<6x128xf32, #tpu.memory_space<vmem>>, vector<6x16xf32>
    %64 = arith.addf %63, %62 : vector<6x16xf32>
    %c0_70 = arith.constant 0 : index
    %c72_71 = arith.constant 72 : index
    %65 = vector.load %arg3[%c0_70, %c72_71] : memref<6x128xf32, #tpu.memory_space<vmem>>, vector<6x16xf32>
    tpu.vector_store %arg3[%c0_70, %c72_71], %64 {strides = array<i32>} : memref<6x128xf32, #tpu.memory_space<vmem>>, vector<6x16xf32>,
    %c0_72 = arith.constant 0 : index
    %c10 = arith.constant 10 : index
    %c0_73 = arith.constant 0 : index
    %66 = vector.load %arg4[%c0_72, %c10, %c0_73] : memref<6x15x64xf32, #tpu.memory_space<vmem>>, vector<6x1x64xf32>
    %67 = vector.shape_cast %66 : vector<6x1x64xf32> to vector<6x64xf32>
    %cst_74 = arith.constant dense<0.000000e+00> : vector<6x16xf32>
    %68 = tpu.matmul %67, %3, %cst_74 {dimension_numbers = #tpu.dot_dimension_numbers<[1], [0], [0], [1], [0, 0, 1, 1], [], []>} : vector<6x64xf32>, vector<64x16xf32>, vector<6x16xf32> -> vector<6x16xf32>
    %c0_75 = arith.constant 0 : index
    %c80 = arith.constant 80 : index
    %69 = vector.load %arg3[%c0_75, %c80] : memref<6x128xf32, #tpu.memory_space<vmem>>, vector<6x16xf32>
    %70 = arith.addf %69, %68 : vector<6x16xf32>
    %c0_76 = arith.constant 0 : index
    %c80_77 = arith.constant 80 : index
    %71 = vector.load %arg3[%c0_76, %c80_77] : memref<6x128xf32, #tpu.memory_space<vmem>>, vector<6x16xf32>
    tpu.vector_store %arg3[%c0_76, %c80_77], %70 {strides = array<i32>} : memref<6x128xf32, #tpu.memory_space<vmem>>, vector<6x16xf32>,
    %c0_78 = arith.constant 0 : index
    %c11 = arith.constant 11 : index
    %c0_79 = arith.constant 0 : index
    %72 = vector.load %arg4[%c0_78, %c11, %c0_79] : memref<6x15x64xf32, #tpu.memory_space<vmem>>, vector<6x1x64xf32>
    %73 = vector.shape_cast %72 : vector<6x1x64xf32> to vector<6x64xf32>
    %cst_80 = arith.constant dense<0.000000e+00> : vector<6x16xf32>
    %74 = tpu.matmul %73, %3, %cst_80 {dimension_numbers = #tpu.dot_dimension_numbers<[1], [0], [0], [1], [0, 0, 1, 1], [], []>} : vector<6x64xf32>, vector<64x16xf32>, vector<6x16xf32> -> vector<6x16xf32>
    %c0_81 = arith.constant 0 : index
    %c88 = arith.constant 88 : index
    %75 = vector.load %arg3[%c0_81, %c88] : memref<6x128xf32, #tpu.memory_space<vmem>>, vector<6x16xf32>
    %76 = arith.addf %75, %74 : vector<6x16xf32>
    %c0_82 = arith.constant 0 : index
    %c88_83 = arith.constant 88 : index
    %77 = vector.load %arg3[%c0_82, %c88_83] : memref<6x128xf32, #tpu.memory_space<vmem>>, vector<6x16xf32>
    tpu.vector_store %arg3[%c0_82, %c88_83], %76 {strides = array<i32>} : memref<6x128xf32, #tpu.memory_space<vmem>>, vector<6x16xf32>,
    %c0_84 = arith.constant 0 : index
    %c12 = arith.constant 12 : index
    %c0_85 = arith.constant 0 : index
    %78 = vector.load %arg4[%c0_84, %c12, %c0_85] : memref<6x15x64xf32, #tpu.memory_space<vmem>>, vector<6x1x64xf32>
    %79 = vector.shape_cast %78 : vector<6x1x64xf32> to vector<6x64xf32>
    %cst_86 = arith.constant dense<0.000000e+00> : vector<6x16xf32>
    %80 = tpu.matmul %79, %3, %cst_86 {dimension_numbers = #tpu.dot_dimension_numbers<[1], [0], [0], [1], [0, 0, 1, 1], [], []>} : vector<6x64xf32>, vector<64x16xf32>, vector<6x16xf32> -> vector<6x16xf32>
    %c0_87 = arith.constant 0 : index
    %c96 = arith.constant 96 : index
    %81 = vector.load %arg3[%c0_87, %c96] : memref<6x128xf32, #tpu.memory_space<vmem>>, vector<6x16xf32>
    %82 = arith.addf %81, %80 : vector<6x16xf32>
    %c0_88 = arith.constant 0 : index
    %c96_89 = arith.constant 96 : index
    %83 = vector.load %arg3[%c0_88, %c96_89] : memref<6x128xf32, #tpu.memory_space<vmem>>, vector<6x16xf32>
    tpu.vector_store %arg3[%c0_88, %c96_89], %82 {strides = array<i32>} : memref<6x128xf32, #tpu.memory_space<vmem>>, vector<6x16xf32>,
    %c0_90 = arith.constant 0 : index
    %c13 = arith.constant 13 : index
    %c0_91 = arith.constant 0 : index
    %84 = vector.load %arg4[%c0_90, %c13, %c0_91] : memref<6x15x64xf32, #tpu.memory_space<vmem>>, vector<6x1x64xf32>
    %85 = vector.shape_cast %84 : vector<6x1x64xf32> to vector<6x64xf32>
    %cst_92 = arith.constant dense<0.000000e+00> : vector<6x16xf32>
    %86 = tpu.matmul %85, %3, %cst_92 {dimension_numbers = #tpu.dot_dimension_numbers<[1], [0], [0], [1], [0, 0, 1, 1], [], []>} : vector<6x64xf32>, vector<64x16xf32>, vector<6x16xf32> -> vector<6x16xf32>
    %c0_93 = arith.constant 0 : index
    %c104 = arith.constant 104 : index
    %87 = vector.load %arg3[%c0_93, %c104] : memref<6x128xf32, #tpu.memory_space<vmem>>, vector<6x16xf32>
    %88 = arith.addf %87, %86 : vector<6x16xf32>
    %c0_94 = arith.constant 0 : index
    %c104_95 = arith.constant 104 : index
    %89 = vector.load %arg3[%c0_94, %c104_95] : memref<6x128xf32, #tpu.memory_space<vmem>>, vector<6x16xf32>
    tpu.vector_store %arg3[%c0_94, %c104_95], %88 {strides = array<i32>} : memref<6x128xf32, #tpu.memory_space<vmem>>, vector<6x16xf32>,
    %c0_96 = arith.constant 0 : index
    %c14 = arith.constant 14 : index
    %c0_97 = arith.constant 0 : index
    %90 = vector.load %arg4[%c0_96, %c14, %c0_97] : memref<6x15x64xf32, #tpu.memory_space<vmem>>, vector<6x1x64xf32>
    %91 = vector.shape_cast %90 : vector<6x1x64xf32> to vector<6x64xf32>
    %cst_98 = arith.constant dense<0.000000e+00> : vector<6x16xf32>
    %92 = tpu.matmul %91, %3, %cst_98 {dimension_numbers = #tpu.dot_dimension_numbers<[1], [0], [0], [1], [0, 0, 1, 1], [], []>} : vector<6x64xf32>, vector<64x16xf32>, vector<6x16xf32> -> vector<6x16xf32>
    %c0_99 = arith.constant 0 : index
    %c112 = arith.constant 112 : index
    %93 = vector.load %arg3[%c0_99, %c112] : memref<6x128xf32, #tpu.memory_space<vmem>>, vector<6x16xf32>
    %94 = arith.addf %93, %92 : vector<6x16xf32>
    %c0_100 = arith.constant 0 : index
    %c112_101 = arith.constant 112 : index
    %95 = vector.load %arg3[%c0_100, %c112_101] : memref<6x128xf32, #tpu.memory_space<vmem>>, vector<6x16xf32>
    tpu.vector_store %arg3[%c0_100, %c112_101], %94 {strides = array<i32>} : memref<6x128xf32, #tpu.memory_space<vmem>>, vector<6x16xf32>,
    return
  }
  func.func @transform_0(%arg0: i32) -> (i32, i32, i32) {
    %c0_i32 = arith.constant 0 : i32
    %c0_i32_0 = arith.constant 0 : i32
    %c0_i32_1 = arith.constant 0 : i32
    return %arg0, %c0_i32, %c0_i32_0 : i32, i32, i32
  }
  func.func @transform_1(%arg0: i32) -> (i32, i32) {
    %c0_i32 = arith.constant 0 : i32
    %c0_i32_0 = arith.constant 0 : i32
    %c0_i32_1 = arith.constant 0 : i32
    return %c0_i32, %c0_i32_0 : i32, i32
  }
  func.func @transform_2(%arg0: i32) -> (i32, i32) {
    %c0_i32 = arith.constant 0 : i32
    %c0_i32_0 = arith.constant 0 : i32
    return %arg0, %c0_i32 : i32, i32
  }
}

module attributes {stable_mosaic.version = 11 : i64} {
  func.func @kernel(%arg0: i32, %arg1: memref<1x15x64xf32, #tpu.memory_space<vmem>>, %arg2: memref<64x16xf32, #tpu.memory_space<vmem>>, %arg3: memref<1x16x8xf32, #tpu.memory_space<vmem>>) attributes {dimension_semantics = [#tpu.dimension_semantics<parallel>], iteration_bounds = array<i64: 6>, scalar_prefetch = 0 : i64, scratch_operands = 0 : i64, tpu.core_type = #tpu.core_type<tc>, window_params = [{transform_indices = @transform_0, window_bounds = array<i64: 1, 15, 64>}, {pipeline_mode = #tpu.pipeline_mode<synchronous>, transform_indices = @transform_1, window_bounds = array<i64: 64, 16>}, {transform_indices = @transform_2, window_bounds = array<i64: 1, 16, 8>}]} {
    %c0 = arith.constant 0 : index
    %c0_0 = arith.constant 0 : index
    %c0_1 = arith.constant 0 : index
    %0 = vector.load %arg1[%c0, %c0_0, %c0_1] : memref<1x15x64xf32, #tpu.memory_space<vmem>>, vector<1x15x64xf32>
    %1 = vector.shape_cast %0 : vector<1x15x64xf32> to vector<15x64xf32>
    %c0_2 = arith.constant 0 : index
    %c0_3 = arith.constant 0 : index
    %2 = vector.load %arg2[%c0_2, %c0_3] : memref<64x16xf32, #tpu.memory_space<vmem>>, vector<64x16xf32>
    %cst = arith.constant dense<0.000000e+00> : vector<15x16xf32>
    %3 = tpu.matmul %1, %2, %cst {dimension_numbers = #tpu.dot_dimension_numbers<[1], [0], [0], [1], [0, 0, 1, 1], [], []>} : vector<15x64xf32>, vector<64x16xf32>, vector<15x16xf32> -> vector<15x16xf32>
    %cst_4 = arith.constant 0.000000e+00 : f32
    %4 = vector.broadcast %cst_4 : f32 to vector<16x8xf32>
    %5 = vector.extract_strided_slice %3 {offsets = [0, 0], sizes = [15, 8], strides = [1, 1]} : vector<15x16xf32> to vector<15x8xf32>
    %c0_i32 = arith.constant 0 : i32
    %6 = arith.sitofp %c0_i32 : i32 to f32
    %7 = vector.broadcast %6 : f32 to vector<1x8xf32>
    %8 = tpu.concatenate %5, %7 in 0 : vector<15x8xf32>, vector<1x8xf32> -> vector<16x8xf32>
    %9 = arith.addf %4, %8 : vector<16x8xf32>
    %10 = vector.extract_strided_slice %3 {offsets = [0, 8], sizes = [15, 8], strides = [1, 1]} : vector<15x16xf32> to vector<15x8xf32>
    %c0_i32_5 = arith.constant 0 : i32
    %11 = arith.sitofp %c0_i32_5 : i32 to f32
    %12 = vector.broadcast %11 : f32 to vector<1x8xf32>
    %13 = tpu.concatenate %12, %10 in 0 : vector<1x8xf32>, vector<15x8xf32> -> vector<16x8xf32>
    %14 = arith.addf %9, %13 : vector<16x8xf32>
    %c0_6 = arith.constant 0 : index
    %c0_7 = arith.constant 0 : index
    %c0_8 = arith.constant 0 : index
    %15 = vector.load %arg3[%c0_6, %c0_7, %c0_8] : memref<1x16x8xf32, #tpu.memory_space<vmem>>, vector<1x16x8xf32>
    %16 = vector.shape_cast %15 : vector<1x16x8xf32> to vector<16x8xf32>
    %17 = vector.shape_cast %14 : vector<16x8xf32> to vector<1x16x8xf32>
    tpu.vector_store %arg3[%c0_6, %c0_7, %c0_8], %17 {strides = array<i32>} : memref<1x16x8xf32, #tpu.memory_space<vmem>>, vector<1x16x8xf32>,
    return
  }
  func.func @transform_0(%arg0: i32) -> (i32, i32, i32) {
    %c0_i32 = arith.constant 0 : i32
    %c0_i32_0 = arith.constant 0 : i32
    %c0_i32_1 = arith.constant 0 : i32
    return %arg0, %c0_i32, %c0_i32_0 : i32, i32, i32
  }
  func.func @transform_1(%arg0: i32) -> (i32, i32) {
    %c0_i32 = arith.constant 0 : i32
    %c0_i32_0 = arith.constant 0 : i32
    %c0_i32_1 = arith.constant 0 : i32
    return %c0_i32, %c0_i32_0 : i32, i32
  }
  func.func @transform_2(%arg0: i32) -> (i32, i32, i32) {
    %c0_i32 = arith.constant 0 : i32
    %c0_i32_0 = arith.constant 0 : i32
    %c0_i32_1 = arith.constant 0 : i32
    return %arg0, %c0_i32, %c0_i32_0 : i32, i32, i32
  }
}

</mosaic_0001>

<bundles_post_ra>
// kernel: _wav_decode_rows.1
= control target key start
LH: loop header
LB: loop body
LE: loop exit
PB: predicated region body
PF: predicated region fallthrough
CT: control target
= control target key end

     0   :  { %s2999_s0 = inlined_call_operand.vmem [shape: f32[6,64,15], index: 0, kind: input, shape index: {}]   ;;  %s3000_s1 = inlined_call_operand.vmem [shape: f32[64,16], index: 1, kind: input, shape index: {}]   ;;  %s3001_s2 = inlined_call_operand.hbm [shape: f32[6,128], index: 2, kind: output, shape index: {}]  }
   0x1   :  { %v20_v0 = vld [vmem:[%s2999_s0 + $0x40] sm:$0xff]  ;;  %v21_v2 = vld [vmem:[%s2999_s0 + $0x48] sm:$0xff]  ;;  %v22_v4 = vld [vmem:[%s2999_s0 + $0x50] sm:$0xff] }
   0x2   :  { %v28_v1 = vld [vmem:[%s2999_s0 + $0x80] sm:$0xff]  ;;  %92 = vxpose.xlu0.b32.start [1/8] (short) (narrow) %v20_v0, 16  ;;  %v29_v3 = vld [vmem:[%s2999_s0 + $0x88] sm:$0xff]  ;;  %v30_v5 = vld [vmem:[%s2999_s0 + $0x90] sm:$0xff] }
   0x3   :  { %124 = vxpose.xlu1.b32.start [1/8] (short) (narrow) %v28_v1, 16  ;;  %v23_v6 = vld [vmem:[%s2999_s0 + $0x58] sm:$0xff]  ;;  %v24_v8 = vld [vmem:[%s2999_s0 + $0x60] sm:$0xff] }
   0x4   :  { %v31_v7 = vld [vmem:[%s2999_s0 + $0x98] sm:$0xff]  ;;  %v32_v9 = vld [vmem:[%s2999_s0 + $0xa0] sm:$0xff] }
   0x6   :  { %93 = vxpose.xlu0.b32.cont [2/8] (short) (narrow) %v21_v2, 16 }
   0x7   :  { %125 = vxpose.xlu1.b32.cont [2/8] (short) (narrow) %v29_v3, 16 }
   0xa   :  { %94 = vxpose.xlu0.b32.cont [3/8] (short) (narrow) %v22_v4, 16 }
   0xb   :  { %126 = vxpose.xlu1.b32.cont [3/8] (short) (narrow) %v30_v5, 16 }
   0xe   :  { %95 = vxpose.xlu0.b32.cont [4/8] (short) (narrow) %v23_v6, 16 }
   0xf   :  { %127 = vxpose.xlu1.b32.cont [4/8] (short) (narrow) %v31_v7, 16 }
  0x10   :  { %7 = vsyncpa [#allocation4], 0  ;;  %v25_v10 = vld [vmem:[%s2999_s0 + $0x68] sm:$0xff]  ;;  %v26_v12 = vld [vmem:[%s2999_s0 + $0x70] sm:$0xff]  ;;  %v2477_v24 = vmov 0.0|0.0   ;;  %v2478_v51 = vmov 0.0  }
  0x11   :  { %v33_v11 = vld [vmem:[%s2999_s0 + $0xa8] sm:$0xff]  ;;  %v34_v13 = vld [vmem:[%s2999_s0 + $0xb0] sm:$0xff]  ;;  %v27_v14 = vld [vmem:[%s2999_s0 + $0x78] sm:$0xff]  ;;  %2255 = vmatprep.subr.bf16.mxu0 %v2477_v24  ;;  %2267 = vmatprep.subr.bf16.mxu1 %v2477_v24  ;;  %274 = vst [vmem:[#allocation3] sm:$0x3f] %v2478_v51  ;;  %vm2479_vm0 = vmmov 0  }
  0x12   :  { %96 = vxpose.xlu0.b32.cont [5/8] (short) (narrow) %v24_v8, 16  ;;  %v35_v15 = vld [vmem:[%s2999_s0 + $0xb8] sm:$0xff]  ;;  %v12_v16 = vld [vmem:[%s2999_s0] sm:$0xff]  ;;  %v13_v18 = vld [vmem:[%s2999_s0 + $0x8] sm:$0xff]  ;;  %1986 = vmatprep.mubr.msk.f32.mxu0 %vm2479_vm0, %v2478_v51  ;;  %vm252_vm1 = vcmask 523264   ;;  %vm254_vm2 = vcmask 522240  }
  0x13   :  { %128 = vxpose.xlu1.b32.cont [5/8] (short) (narrow) %v32_v9, 16  ;;  %v36_v17 = vld [vmem:[%s2999_s0 + $0xc0] sm:$0xff]  ;;  %v37_v19 = vld [vmem:[%s2999_s0 + $0xc8] sm:$0xff]  ;;  %v14_v20 = vld [vmem:[%s2999_s0 + $0x10] sm:$0xff]  ;;  %2005 = vmatprep.mubr.msk.f32.mxu1 %vm2479_vm0, %v2478_v51  ;;  %vm288_vm3 = vcmask 1041409   ;;  %vm291_vm4 = vcmask 1042434  }
  0x14   :  { %v38_v21 = vld [vmem:[%s2999_s0 + $0xd0] sm:$0xff]  ;;  %v266_v22 = vld [vmem:[%s3000_s1] sm:$0xff]  ;;  %v267_v23 = vld [vmem:[%s3000_s1 + $0x8] sm:$0xff]  ;;  %vm294_vm5 = vcmask 1043459   ;;  %vm297_vm6 = vcmask 1044484   ;;  %vm300_vm7 = vcmask 1045509  }
  0x15   :  { %v2584_v25 = vpack.c.bf16 %v267_v23, %v266_v22  ;;  %v15_v26 = vld [vmem:[%s2999_s0 + $0x18] sm:$0xff]  ;;  %v16_v28 = vld [vmem:[%s2999_s0 + $0x20] sm:$0xff]  ;;  %v17_v30 = vld [vmem:[%s2999_s0 + $0x28] sm:$0xff]  ;;  %vm376_vm8 = vcmask 128000   ;;  %s2481_s8 = smov 16   ;;  %s2482_s9 = smov 24  }
  0x16   :  { %97 = vxpose.xlu0.b32.cont [6/8] (short) (narrow) %v25_v10, 16  ;;  %v39_v27 = vld [vmem:[%s2999_s0 + $0xd8] sm:$0xff]  ;;  %v40_v29 = vld [vmem:[%s2999_s0 + $0xe0] sm:$0xff]  ;;  %v41_v31 = vld [vmem:[%s2999_s0 + $0xe8] sm:$0xff]  ;;  %s2483_s10 = smov 32   ;;  %s2484_s11 = smov 40  }
  0x17   :  { %129 = vxpose.xlu1.b32.cont [6/8] (short) (narrow) %v33_v11, 16  ;;  %2257 = vmatpush3.bf16.msra.mxu0 %v2584_v25  ;;  %v18_v32 = vld [vmem:[%s2999_s0 + $0x30] sm:$0xff]  ;;  %v19_v34 = vld [vmem:[%s2999_s0 + $0x38] sm:$0xff]  ;;  %v44_v36 = vld [vmem:[%s2999_s0 + $0x100] sm:$0xff]  ;;  %s2485_s12 = smov 56   ;;  %s2486_s13 = smov 48  }
  0x18   :  { %2269 = vmatpush3.bf16.msra.mxu1 %v2584_v25  ;;  %2258 = vmatprep.subr.bf16.mxu0 %v2477_v24  ;;  %v42_v33 = vld [vmem:[%s2999_s0 + $0xf0] sm:$0xff]  ;;  %v43_v35 = vld [vmem:[%s2999_s0 + $0xf8] sm:$0xff]  ;;  %v52_v37 = vld [vmem:[%s2999_s0 + $0x140] sm:$0xff]  ;;  %s2487_s14 = smov 72   ;;  %s2488_s15 = smov 64   ;;  %vm478_vm9 = vcmask 193600  }
  0x19   :  { %2270 = vmatprep.subr.bf16.mxu1 %v2477_v24  ;;  %v268_v38 = vld [vmem:[%s3000_s1 + $0x10] sm:$0xff]  ;;  %v269_v39 = vld [vmem:[%s3000_s1 + $0x18] sm:$0xff]  ;;  %v45_v41 = vld [vmem:[%s2999_s0 + $0x108] sm:$0xff]  ;;  %s2489_s16 = smov 88   ;;  %s2490_s17 = smov 80   ;;  %vm580_vm10 = vcmask 259200  }
  0x1a   :  { %98 = vxpose.xlu0.b32.cont [7/8] (short) (narrow) %v26_v12, 16  ;;  %v2632_v40 = vpack.c.bf16 %v269_v39, %v268_v38  ;;  %v53_v42 = vld [vmem:[%s2999_s0 + $0x148] sm:$0xff]  ;;  %v270_v43 = vld [vmem:[%s3000_s1 + $0x20] sm:$0xff]  ;;  %v46_v46 = vld [vmem:[%s2999_s0 + $0x110] sm:$0xff]  ;;  %s2492_s18 = smov 96   ;;  %s2493_s19 = smov 112  }
  0x1b   :  { %130 = vxpose.xlu1.b32.cont [7/8] (short) (narrow) %v34_v13, 16  ;;  %v271_v44 = vld [vmem:[%s3000_s1 + $0x28] sm:$0xff]  ;;  %v54_v47 = vld [vmem:[%s2999_s0 + $0x150] sm:$0xff]  ;;  %v273_v49 = vld [vmem:[%s3000_s1 + $0x38] sm:$0xff]  ;;  %vm682_vm11 = vcmask 324800   ;;  %vm784_vm12 = vcmask 390400  }
  0x1c   :  { %2260 = vmatpush3.bf16.msra.mxu0 %v2632_v40  ;;  %2272 = vmatpush3.bf16.msra.mxu1 %v2632_v40  ;;  %v2650_v45 = vpack.c.bf16 %v271_v44, %v270_v43  ;;  %v272_v48 = vld [vmem:[%s3000_s1 + $0x30] sm:$0xff]  ;;  %v47_v52 = vld [vmem:[%s2999_s0 + $0x118] sm:$0xff]  ;;  %v48_v54 = vld [vmem:[%s2999_s0 + $0x120] sm:$0xff]  ;;  %s2491_s1 = smov 104   ;;  %vm886_vm13 = vcmask 456000   ;;  %vm988_vm14 = vcmask 521600  }
  0x1d   :  { %2261 = vmatprep.subr.bf16.mxu0 %v2477_v24  ;;  %2273 = vmatprep.subr.bf16.mxu1 %v2477_v24  ;;  %v2668_v50 = vpack.c.bf16 %v273_v49, %v272_v48  ;;  %v55_v53 = vld [vmem:[%s2999_s0 + $0x158] sm:$0xff]  ;;  %v56_v55 = vld [vmem:[%s2999_s0 + $0x160] sm:$0xff]  ;;  %v49_v56 = vld [vmem:[%s2999_s0 + $0x128] sm:$0xff]  ;;  %vm1090_vm15 = vcmask 587200   ;;  %s2494_s20 = smov [#allocation3]  }
  0x1e   :  { %99 = vxpose.xlu0.b32.end [8/8] (short) (narrow) %v27_v14, 16  ;;  %v57_v57 = vld [vmem:[%s2999_s0 + $0x168] sm:$0xff]  ;;  %v50_v58 = vld [vmem:[%s2999_s0 + $0x130] sm:$0xff]  ;;  %v51_v60 = vld [vmem:[%s2999_s0 + $0x138] sm:$0xff]  ;;  %s1812_s21 = sshll.u32 %s2494_s20, 4  ;;  %s1813_s21 = int_to_ptr.vmem [resolvable:$true] %s1812_s21 }
  0x1f   :  { %131 = vxpose.xlu1.b32.end [8/8] (short) (narrow) %v35_v15, 16  ;;  %v58_v59 = vld [vmem:[%s2999_s0 + $0x170] sm:$0xff]  ;;  %v59_v61 = vld [vmem:[%s2999_s0 + $0x178] sm:$0xff]  ;;  %s2480_s0 = smov 8   ;;  %s2453_s22 = scalar_lea.vmem %s1813_s21, 128 }
  0x20   :  { %2263 = vmatpush3.bf16.msra.mxu0 %v2650_v45  ;;  %2275 = vmatpush3.bf16.msra.mxu1 %v2650_v45  ;;  %p2454_p0 = scmp.ne.s32.totalorder %s1813_s21, %s2453_s22  ;;  %p2458_p1 = scmp.lt.s32.totalorder %s1813_s21, %s1813_s21 }
  0x21   :  { %2264 = vmatprep.subr.bf16.mxu0 %v2477_v24  ;;  %2276 = vmatprep.subr.bf16.mxu1 %v2477_v24  ;;  %p2459_p2 = scmp.lt.s32.totalorder %s2453_s22, %s2453_s22 }
  0x22   :  { %60 = vxpose.xlu0.b32.start [1/8] (short) (narrow) %v12_v16, 16 }
  0x23   :  { %156 = vxpose.xlu1.b32.start [1/8] (short) (narrow) %v36_v17, 16  ;;  %p2460_p3 = por %p2459_p2, %p2458_p1 }
  0x24   :  { %2266 = vmatpush3.bf16.msra.mxu0 %v2668_v50  ;;  %2278 = vmatpush3.bf16.msra.mxu1 %v2668_v50 }
  0x25   :  { %2279 = vmatprep.subr.bf16.mxu0 %v2477_v24  ;;  %2291 = vmatprep.subr.bf16.mxu1 %v2477_v24  ;;  %p2461_p4 = pnand %p2460_p3, %p2454_p0 }
  0x26   :  { %61 = vxpose.xlu0.b32.cont [2/8] (short) (narrow) %v13_v18, 16 }
  0x27   :  { %157 = vxpose.xlu1.b32.cont [2/8] (short) (narrow) %v37_v19, 16 }
  0x2a   :  { %62 = vxpose.xlu0.b32.cont [3/8] (short) (narrow) %v14_v20, 16 }
  0x2b   :  { %158 = vxpose.xlu1.b32.cont [3/8] (short) (narrow) %v38_v21, 16 }
  0x2e   :  { %63 = vxpose.xlu0.b32.cont [4/8] (short) (narrow) %v15_v26, 16 }
  0x2f   :  { %159 = vxpose.xlu1.b32.cont [4/8] (short) (narrow) %v39_v27, 16 }
  0x32   :  { %64 = vxpose.xlu0.b32.cont [5/8] (short) (narrow) %v16_v28, 16 }
  0x33   :  { %160 = vxpose.xlu1.b32.cont [5/8] (short) (narrow) %v40_v29, 16 }
  0x36   :  { %65 = vxpose.xlu0.b32.cont [6/8] (short) (narrow) %v17_v30, 16 }
  0x37   :  { %161 = vxpose.xlu1.b32.cont [6/8] (short) (narrow) %v41_v31, 16 }
  0x3a   :  { %66 = vxpose.xlu0.b32.cont [7/8] (short) (narrow) %v18_v32, 16 }
  0x3b   :  { %162 = vxpose.xlu1.b32.cont [7/8] (short) (narrow) %v42_v33, 16 }
  0x3e   :  { %67 = vxpose.xlu0.b32.end [8/8] (short) (narrow) %v19_v34, 16 }
  0x3f   :  { %163 = vxpose.xlu1.b32.end [8/8] (short) (narrow) %v43_v35, 16 }
  0x42   :  { %188 = vxpose.xlu0.b32.start [1/8] (short) (narrow) %v44_v36, 16 }
  0x43   :  { %220 = vxpose.xlu1.b32.start [1/8] (short) (narrow) %v52_v37, 16 }
  0x46   :  { %189 = vxpose.xlu0.b32.cont [2/8] (short) (narrow) %v45_v41, 16 }
  0x47   :  { %221 = vxpose.xlu1.b32.cont [2/8] (short) (narrow) %v53_v42, 16 }
  0x4a   :  { %190 = vxpose.xlu0.b32.cont [3/8] (short) (narrow) %v46_v46, 16 }
  0x4b   :  { %222 = vxpose.xlu1.b32.cont [3/8] (short) (narrow) %v54_v47, 16 }
  0x4e   :  { %191 = vxpose.xlu0.b32.cont [4/8] (short) (narrow) %v47_v52, 16 }
  0x4f   :  { %223 = vxpose.xlu1.b32.cont [4/8] (short) (narrow) %v55_v53, 16 }
  0x52   :  { %192 = vxpose.xlu0.b32.cont [5/8] (short) (narrow) %v48_v54, 16 }
  0x53   :  { %224 = vxpose.xlu1.b32.cont [5/8] (short) (narrow) %v56_v55, 16 }
  0x56   :  { %193 = vxpose.xlu0.b32.cont [6/8] (short) (narrow) %v49_v56, 16 }
  0x57   :  { %225 = vxpose.xlu1.b32.cont [6/8] (short) (narrow) %v57_v57, 16 }
  0x5a   :  { %194 = vxpose.xlu0.b32.cont [7/8] (short) (narrow) %v50_v58, 16 }
  0x5b   :  { %226 = vxpose.xlu1.b32.cont [7/8] (short) (narrow) %v58_v59, 16 }
  0x5e   :  { %195 = vxpose.xlu0.b32.end [8/8] (short) (narrow) %v51_v60, 16 }
  0x5f   :  { %227 = vxpose.xlu1.b32.end [8/8] (short) (narrow) %v59_v61, 16 }
  0x82   :  { %v108_v63 = vpop.trf.xlu0 }
  0x83   :  { %v140_v62 = vpop.trf.xlu1  ;;  %256 = vst.msk [vmem:[#allocation2 + $0x10] sm:$0xff] %vm252_vm1, %v108_v63 }
  0x84   :  { %258 = vst.msk [vmem:[#allocation2 + $0x20] sm:$0xff] %vm252_vm1, %v140_v62 }
  0x86   :  { %v109_v1 = vpop.trf.xlu0 }
  0x87   :  { %v141_v0 = vpop.trf.xlu1  ;;  %257 = vst.msk [vmem:[#allocation2 + $0x18] sm:$0x7f] %vm254_vm2, %v109_v1 }
  0x88   :  { %259 = vst.msk [vmem:[#allocation2 + $0x28] sm:$0x7f] %vm254_vm2, %v141_v0 }
  0x8e   :  { %v1093_v6 = vld [vmem:[#allocation2 + $0x18] sm:$0x1]  ;;  %v1195_v8 = vld [vmem:[#allocation2 + $0x19] sm:$0x1]  ;;  %v1297_v10 = vld [vmem:[#allocation2 + $0x1a] sm:$0x1] }
  0x8f   :  { %v1094_v7 = vld [vmem:[#allocation2 + $0x28] sm:$0x1]  ;;  %v1196_v9 = vld [vmem:[#allocation2 + $0x29] sm:$0x1]  ;;  %v1298_v11 = vld [vmem:[#allocation2 + $0x2a] sm:$0x1] }
  0x90   :  { %v1399_v12 = vld [vmem:[#allocation2 + $0x1b] sm:$0x1]  ;;  %v1400_v13 = vld [vmem:[#allocation2 + $0x2b] sm:$0x1]  ;;  %v1104_v14 = vrot.slane %v1093_v6, 7  ;;  %v1106_v15 = vrot.slane %v1094_v7, 6 }
  0x91   :  { %v1501_v16 = vld [vmem:[#allocation2 + $0x1c] sm:$0x1]  ;;  %v1502_v17 = vld [vmem:[#allocation2 + $0x2c] sm:$0x1]  ;;  %v1206_v18 = vrot.slane %v1195_v8, 7  ;;  %v1208_v19 = vrot.slane %v1196_v9, 6 }
  0x92   :  { %v1603_v20 = vld [vmem:[#allocation2 + $0x1d] sm:$0x1]  ;;  %v1604_v21 = vld [vmem:[#allocation2 + $0x2d] sm:$0x1]  ;;  %v1308_v22 = vrot.slane %v1297_v10, 7  ;;  %v1310_v23 = vrot.slane %v1298_v11, 6 }
  0x93   :  { %v1410_v26 = vrot.slane %v1399_v12, 7  ;;  %v1412_v27 = vrot.slane %v1400_v13, 6  ;;  %v1705_v28 = vld [vmem:[#allocation2 + $0x1e] sm:$0x1]  ;;  %v1512_v30 = vrot.slane %v1501_v16, 7  ;;  %v1514_v31 = vrot.slane %v1502_v17, 6 }
  0x94   :  { %v1706_v32 = vld [vmem:[#allocation2 + $0x2e] sm:$0x1]  ;;  %v1614_v36 = vrot.slane %v1603_v20, 7  ;;  %v1616_v37 = vrot.slane %v1604_v21, 6  ;;  %v1716_v44 = vrot.slane %v1705_v28, 7 }
  0x95   :  { %v1718_v53 = vrot.slane %v1706_v32, 6 }
  0xa2   :  { %v76_v3 = vpop.trf.xlu0 }
  0xa3   :  { %v172_v2 = vpop.trf.xlu1  ;;  %253 = vst.msk [vmem:[#allocation2] sm:$0xff] %vm252_vm1, %v76_v3 }
  0xa4   :  { %260 = vst.msk [vmem:[#allocation2 + $0x30] sm:$0xff] %vm252_vm1, %v172_v2 }
  0xa6   :  { %v77_v5 = vpop.trf.xlu0 }
  0xa7   :  { %v173_v4 = vpop.trf.xlu1  ;;  %255 = vst.msk [vmem:[#allocation2 + $0x8] sm:$0x7f] %vm254_vm2, %v77_v5 }
  0xa8   :  { %261 = vst.msk [vmem:[#allocation2 + $0x38] sm:$0x7f] %vm254_vm2, %v173_v4 }
  0xaa   :  { %v275_v28 = vld [vmem:[#allocation2] sm:$0x1] }
  0xab   :  { %v381_v32 = vld [vmem:[#allocation2 + $0x31] sm:$0x1] }
  0xae   :  { %v1092_v29 = vld [vmem:[#allocation2 + $0x8] sm:$0x1]  ;;  %v1194_v35 = vld [vmem:[#allocation2 + $0x9] sm:$0x1]  ;;  %v1296_v43 = vld [vmem:[#allocation2 + $0xa] sm:$0x1] }
  0xaf   :  { %v1095_v33 = vld [vmem:[#allocation2 + $0x38] sm:$0x1]  ;;  %v1105_v34 = vsel %vm288_vm3, %v1104_v14, %v1092_v29  ;;  %v1197_v41 = vld [vmem:[#allocation2 + $0x39] sm:$0x1]  ;;  %v1207_v42 = vsel %vm288_vm3, %v1206_v18, %v1194_v35  ;;  %v1299_v48 = vld [vmem:[#allocation2 + $0x3a] sm:$0x1]  ;;  %v1309_v49 = vsel %vm288_vm3, %v1308_v22, %v1296_v43 }
  0xb0   :  { %v1107_v38 = vsel %vm291_vm4, %v1106_v15, %v1105_v34  ;;  %v1108_v39 = vrot.slane %v1095_v33, 5  ;;  %v1209_v46 = vsel %vm291_vm4, %v1208_v19, %v1207_v42  ;;  %v1210_v47 = vrot.slane %v1197_v41, 5  ;;  %v1398_v52 = vld [vmem:[#allocation2 + $0xb] sm:$0x1]  ;;  %v1401_v57 = vld [vmem:[#allocation2 + $0x3b] sm:$0x1] }
  0xb1   :  { %v1311_v55 = vsel %vm291_vm4, %v1310_v23, %v1309_v49  ;;  %v1312_v56 = vrot.slane %v1299_v48, 5  ;;  %v1411_v58 = vsel %vm288_vm3, %v1410_v26, %v1398_v52  ;;  %v1500_v59 = vld [vmem:[#allocation2 + $0xc] sm:$0x1]  ;;  %v1414_v62 = vrot.slane %v1401_v57, 5  ;;  %v1503_v63 = vld [vmem:[#allocation2 + $0x3c] sm:$0x1] }
  0xb2   :  { %v2723_v54 = vsel %vm294_vm5, %v1108_v39, %v1107_v38  ;;  %v2728_v60 = vsel %vm294_vm5, %v1210_v47, %v1209_v46  ;;  %v1413_v61 = vsel %vm291_vm4, %v1412_v27, %v1411_v58  ;;  %v1513_v0 = vsel %vm288_vm3, %v1512_v30, %v1500_v59  ;;  %v1602_v1 = vld [vmem:[#allocation2 + $0xd] sm:$0x1]  ;;  %v1605_v5 = vld [vmem:[#allocation2 + $0x3d] sm:$0x1]  ;;  %v1704_v7 = vld [vmem:[#allocation2 + $0xe] sm:$0x1] }
  0xb3   :  { %v2733_v2 = vsel %vm294_vm5, %v1312_v56, %v1311_v55  ;;  %v1515_v3 = vsel %vm291_vm4, %v1514_v31, %v1513_v0  ;;  %v1516_v4 = vrot.slane %v1503_v63, 5  ;;  %v1615_v6 = vsel %vm288_vm3, %v1614_v36, %v1602_v1  ;;  %v1707_v11 = vld [vmem:[#allocation2 + $0x3e] sm:$0x1]  ;;  %v276_v18 = vld [vmem:[#allocation2 + $0x10] sm:$0x1] }
  0xb4   :  { %v2738_v8 = vsel %vm294_vm5, %v1414_v62, %v1413_v61  ;;  %v1617_v9 = vsel %vm291_vm4, %v1616_v37, %v1615_v6  ;;  %v1618_v10 = vrot.slane %v1605_v5, 5  ;;  %v1717_v12 = vsel %vm288_vm3, %v1716_v44, %v1704_v7  ;;  %v379_v19 = vld [vmem:[#allocation2 + $0x11] sm:$0x1]  ;;  %v277_v22 = vld [vmem:[#allocation2 + $0x20] sm:$0x1] }
  0xb5   :  { %v2743_v13 = vsel %vm294_vm5, %v1516_v4, %v1515_v3  ;;  %v1719_v14 = vsel %vm291_vm4, %v1718_v53, %v1717_v12  ;;  %v1720_v15 = vrot.slane %v1707_v11, 5  ;;  %v287_v23 = vrot.slane %v276_v18, 7  ;;  %v380_v26 = vld [vmem:[#allocation2 + $0x21] sm:$0x1]  ;;  %v278_v30 = vld [vmem:[#allocation2 + $0x30] sm:$0x1] }
  0xb6   :  { %v2747_v16 = vsel %vm294_vm5, %v1618_v10, %v1617_v9  ;;  %v390_v27 = vrot.slane %v379_v19, 7  ;;  %v378_v29 = vld [vmem:[#allocation2 + $0x1] sm:$0x1]  ;;  %v290_v31 = vrot.slane %v277_v22, 6  ;;  %v392_v33 = vrot.slane %v380_v26, 6 }
  0xb7   :  { %v2750_v17 = vsel %vm294_vm5, %v1720_v15, %v1719_v14  ;;  %v289_v36 = vsel %vm288_vm3, %v287_v23, %v275_v28  ;;  %v481_v38 = vld [vmem:[#allocation2 + $0x12] sm:$0x1]  ;;  %v293_v39 = vrot.slane %v278_v30, 5  ;;  %v394_v41 = vrot.slane %v381_v32, 5  ;;  %v482_v42 = vld [vmem:[#allocation2 + $0x22] sm:$0x1] }
  0xb8   :  { %v391_v37 = vsel %vm288_vm3, %v390_v27, %v378_v29  ;;  %v583_v43 = vld [vmem:[#allocation2 + $0x13] sm:$0x1]  ;;  %v292_v44 = vsel %vm291_vm4, %v290_v31, %v289_v36  ;;  %v480_v47 = vld [vmem:[#allocation2 + $0x2] sm:$0x1]  ;;  %v492_v48 = vrot.slane %v481_v38, 7  ;;  %v494_v6 = vrot.slane %v482_v42, 6 }
  0xb9   :  { %v393_v46 = vsel %vm291_vm4, %v392_v33, %v391_v37  ;;  %v584_v49 = vld [vmem:[#allocation2 + $0x23] sm:$0x1]  ;;  %v594_v61 = vrot.slane %v583_v43, 7  ;;  %v295_v62 = vsel %vm294_vm5, %v293_v39, %v292_v44  ;;  %v483_v5 = vld [vmem:[#allocation2 + $0x32] sm:$0x1] }
  0xba   :  { %v395_v63 = vsel %vm294_vm5, %v394_v41, %v393_v46  ;;  %v582_v1 = vld [vmem:[#allocation2 + $0x3] sm:$0x1]  ;;  %v493_v10 = vsel %vm288_vm3, %v492_v48, %v480_v47  ;;  %v585_v11 = vld [vmem:[#allocation2 + $0x33] sm:$0x1]  ;;  %v596_v12 = vrot.slane %v584_v49, 6  ;;  %v496_v19 = vrot.slane %v483_v5, 5 }
  0xbb   :  { %v595_v18 = vsel %vm288_vm3, %v594_v61, %v582_v1 }
  0xbc   :  { %v597_v23 = vsel %vm291_vm4, %v596_v12, %v595_v18 }
  0xc2   :  { %v204_v20 = vpop.trf.xlu0 }
  0xc3   :  { %v236_v21 = vpop.trf.xlu1  ;;  %262 = vst.msk [vmem:[#allocation2 + $0x40] sm:$0xff] %vm252_vm1, %v204_v20  ;;  %v495_v20 = vsel %vm291_vm4, %v494_v6, %v493_v10 }
  0xc4   :  { %264 = vst.msk [vmem:[#allocation2 + $0x50] sm:$0xff] %vm252_vm1, %v236_v21  ;;  %v598_v21 = vrot.slane %v585_v11, 5  ;;  %v497_v33 = vsel %vm294_vm5, %v496_v19, %v495_v20  ;;  %v787_v19 = vld [vmem:[#allocation2 + $0x15] sm:$0x1] }
  0xc6   :  { %v205_v34 = vpop.trf.xlu0  ;;  %v599_v41 = vsel %vm294_vm5, %v598_v21, %v597_v23  ;;  %v788_v23 = vld [vmem:[#allocation2 + $0x25] sm:$0x1] }
  0xc7   :  { %v237_v35 = vpop.trf.xlu1  ;;  %263 = vst.msk [vmem:[#allocation2 + $0x48] sm:$0x7f] %vm254_vm2, %v205_v34 }
  0xc8   :  { %265 = vst.msk [vmem:[#allocation2 + $0x58] sm:$0x7f] %vm254_vm2, %v237_v35  ;;  %vm1396_vm2 = vcmask 784000  }
  0xca   :  { %v279_v52 = vld [vmem:[#allocation2 + $0x40] sm:$0x1]  ;;  %v382_v55 = vld [vmem:[#allocation2 + $0x41] sm:$0x1]  ;;  %v2769_v14 = vld [vmem:[#allocation2 + $0x42] sm:$0x1] }
  0xcb   :  { %v280_v53 = vld [vmem:[#allocation2 + $0x50] sm:$0x1]  ;;  %v296_v56 = vrot.slane %v279_v52, 4  ;;  %v383_v58 = vld [vmem:[#allocation2 + $0x51] sm:$0x1]  ;;  %v396_v59 = vrot.slane %v382_v55, 4 }
  0xcc   :  { %v299_v57 = vrot.slane %v280_v53, 3  ;;  %v398_v0 = vrot.slane %v383_v58, 3  ;;  %v2771_v15 = vld [vmem:[#allocation2 + $0x43] sm:$0x1]  ;;  %v498_v22 = vrot.slane %v2769_v14, 4 }
  0xcd   :  { %v298_v3 = vsel %vm297_vm6, %v296_v56, %v295_v62  ;;  %v397_v4 = vsel %vm297_vm6, %v396_v59, %v395_v63  ;;  %v600_v26 = vrot.slane %v2771_v15, 4  ;;  %v485_v38 = vld [vmem:[#allocation2 + $0x52] sm:$0x1]  ;;  %v587_v39 = vld [vmem:[#allocation2 + $0x53] sm:$0x1] }
  0xce   :  { %v301_v7 = vsel %vm300_vm7, %v299_v57, %v298_v3  ;;  %v399_v9 = vsel %vm300_vm7, %v398_v0, %v397_v4  ;;  %v1096_v27 = vld [vmem:[#allocation2 + $0x48] sm:$0x1]  ;;  %v1198_v31 = vld [vmem:[#allocation2 + $0x49] sm:$0x1]  ;;  %v1300_v36 = vld [vmem:[#allocation2 + $0x4a] sm:$0x1]  ;;  %v499_v12 = vsel %vm297_vm6, %v498_v22, %v497_v33 }
  0xcf   :  { %1987 = vmatmul.mubr.msk.f32.vlgmr.msra.gmra.mrb[0].mxu0 %vm252_vm1, %v301_v7  ;;  %2006 = vmatmul.mubr.msk.f32.vlgmr.msra.gmra.mrb[0].mxu1 %vm252_vm1, %v399_v9  ;;  %v1097_v28 = vld [vmem:[#allocation2 + $0x58] sm:$0x1]  ;;  %v1110_v29 = vrot.slane %v1096_v27, 4  ;;  %v1199_v32 = vld [vmem:[#allocation2 + $0x59] sm:$0x1]  ;;  %v1212_v34 = vrot.slane %v1198_v31, 4  ;;  %v601_v14 = vsel %vm297_vm6, %v600_v26, %v599_v41 }
  0xd0   :  { %2281 = vmatpush3.bf16.msra.mxu0 %v2584_v25  ;;  %2293 = vmatpush3.bf16.msra.mxu1 %v2584_v25  ;;  %v1112_v30 = vrot.slane %v1097_v28, 3  ;;  %v1214_v35 = vrot.slane %v1199_v32, 3  ;;  %v1301_v37 = vld [vmem:[#allocation2 + $0x5a] sm:$0x1]  ;;  %v1314_v43 = vrot.slane %v1300_v36, 4  ;;  %v500_v9 = vrot.slane %v485_v38, 3 }
  0xd1   :  { %2282 = vmatprep.subr.bf16.mxu0 %v2477_v24  ;;  %2294 = vmatprep.subr.bf16.mxu1 %v2477_v24  ;;  %v1111_v42 = vsel %vm297_vm6, %v1110_v29, %v2723_v54  ;;  %v1316_v44 = vrot.slane %v1301_v37, 3  ;;  %v1402_v46 = vld [vmem:[#allocation2 + $0x4b] sm:$0x1]  ;;  %v1403_v47 = vld [vmem:[#allocation2 + $0x5b] sm:$0x1]  ;;  %v1213_v49 = vsel %vm297_vm6, %v1212_v34, %v2728_v60  ;;  %v602_v10 = vrot.slane %v587_v39, 3 }
  0xd2   :  { %2024 = vmatprep.mubr.msk.f32.mxu0 %vm2479_vm0, %v2478_v51  ;;  %2043 = vmatprep.mubr.msk.f32.mxu1 %vm2479_vm0, %v2478_v51  ;;  %v2795_v48 = vsel %vm300_vm7, %v1112_v30, %v1111_v42  ;;  %v1416_v52 = vrot.slane %v1402_v46, 4  ;;  %v1418_v53 = vrot.slane %v1403_v47, 3  ;;  %v1504_v55 = vld [vmem:[#allocation2 + $0x4c] sm:$0x1]  ;;  %v1505_v56 = vld [vmem:[#allocation2 + $0x5c] sm:$0x1]  ;;  %v2800_v57 = vsel %vm300_vm7, %v1214_v35, %v1213_v49 }
  0xd3   :  { %v1315_v54 = vsel %vm297_vm6, %v1314_v43, %v2733_v2  ;;  %v1518_v58 = vrot.slane %v1504_v55, 4  ;;  %v1520_v59 = vrot.slane %v1505_v56, 3  ;;  %v1606_v61 = vld [vmem:[#allocation2 + $0x4d] sm:$0x1]  ;;  %v1607_v62 = vld [vmem:[#allocation2 + $0x5d] sm:$0x1]  ;;  %v501_v20 = vsel %vm300_vm7, %v500_v9, %v499_v12 }
  0xd4   :  { %2284 = vmatpush3.bf16.msra.mxu0 %v2632_v40  ;;  %2296 = vmatpush3.bf16.msra.mxu1 %v2632_v40  ;;  %v2807_v60 = vsel %vm300_vm7, %v1316_v44, %v1315_v54  ;;  %v1417_v63 = vsel %vm297_vm6, %v1416_v52, %v2738_v8  ;;  %v1620_v0 = vrot.slane %v1606_v61, 4  ;;  %v1622_v1 = vrot.slane %v1607_v62, 3  ;;  %v1708_v3 = vld [vmem:[#allocation2 + $0x4e] sm:$0x1]  ;;  %v1709_v4 = vld [vmem:[#allocation2 + $0x5e] sm:$0x1] }
  0xd5   :  { %2285 = vmatprep.subr.bf16.mxu0 %v2477_v24  ;;  %2297 = vmatprep.subr.bf16.mxu1 %v2477_v24  ;;  %v2814_v2 = vsel %vm300_vm7, %v1418_v53, %v1417_v63  ;;  %v1519_v5 = vsel %vm297_vm6, %v1518_v58, %v2743_v13  ;;  %v1722_v6 = vrot.slane %v1708_v3, 4  ;;  %v1724_v7 = vrot.slane %v1709_v4, 3  ;;  %v684_v27 = vld [vmem:[#allocation2 + $0x4] sm:$0x1]  ;;  %v786_v28 = vld [vmem:[#allocation2 + $0x5] sm:$0x1] }
  0xd6   :  { %v2819_v8 = vsel %vm300_vm7, %v1520_v59, %v1519_v5  ;;  %v1621_v11 = vsel %vm297_vm6, %v1620_v0, %v2747_v16  ;;  %v685_v16 = vld [vmem:[#allocation2 + $0x14] sm:$0x1]  ;;  %v603_v21 = vsel %vm300_vm7, %v602_v10, %v601_v14  ;;  %v798_v26 = vrot.slane %v787_v19, 7  ;;  %v789_v31 = vld [vmem:[#allocation2 + $0x35] sm:$0x1] }
  0xd7   :  { %v2826_v15 = vsel %vm300_vm7, %v1622_v1, %v1621_v11  ;;  %v1723_v13 = vsel %vm297_vm6, %v1722_v6, %v2750_v17  ;;  %v686_v17 = vld [vmem:[#allocation2 + $0x24] sm:$0x1]  ;;  %v696_v22 = vrot.slane %v685_v16, 7  ;;  %v687_v29 = vld [vmem:[#allocation2 + $0x34] sm:$0x1]  ;;  %v800_v32 = vrot.slane %v788_v23, 6 }
  0xd8   :  { %2287 = vmatpush3.bf16.msra.mxu0 %v2650_v45  ;;  %2299 = vmatpush3.bf16.msra.mxu1 %v2650_v45  ;;  %v2833_v18 = vsel %vm300_vm7, %v1724_v7, %v1723_v13  ;;  %v698_v30 = vrot.slane %v686_v17, 6  ;;  %v688_v33 = vld [vmem:[#allocation2 + $0x44] sm:$0x1]  ;;  %v790_v35 = vld [vmem:[#allocation2 + $0x45] sm:$0x1]  ;;  %v799_v36 = vsel %vm288_vm3, %v798_v26, %v786_v28  ;;  %v700_v37 = vrot.slane %v687_v29, 5 }
  0xd9   :  { %2288 = vmatprep.subr.bf16.mxu0 %v2477_v24  ;;  %2300 = vmatprep.subr.bf16.mxu1 %v2477_v24  ;;  %v697_v34 = vsel %vm288_vm3, %v696_v22, %v684_v27  ;;  %v802_v38 = vrot.slane %v789_v31, 5  ;;  %v689_v39 = vld [vmem:[#allocation2 + $0x54] sm:$0x1]  ;;  %v702_v42 = vrot.slane %v688_v33, 4  ;;  %v791_v43 = vld [vmem:[#allocation2 + $0x55] sm:$0x1]  ;;  %v801_v44 = vsel %vm291_vm4, %v800_v32, %v799_v36 }
  0xda   :  { %v699_v41 = vsel %vm291_vm4, %v698_v30, %v697_v34  ;;  %v804_v46 = vrot.slane %v790_v35, 4  ;;  %v704_v49 = vrot.slane %v689_v39, 3  ;;  %v806_v53 = vrot.slane %v791_v43, 3  ;;  %v889_v54 = vld [vmem:[#allocation2 + $0x16] sm:$0x1] }
  0xdb   :  { %v701_v47 = vsel %vm294_vm5, %v700_v37, %v699_v41  ;;  %v803_v52 = vsel %vm294_vm5, %v802_v38, %v801_v44  ;;  %v991_v58 = vld [vmem:[#allocation2 + $0x17] sm:$0x1]  ;;  %v890_v62 = vld [vmem:[#allocation2 + $0x26] sm:$0x1]  ;;  %v900_v63 = vrot.slane %v889_v54, 7 }
  0xdc   :  { %2290 = vmatpush3.bf16.msra.mxu0 %v2668_v50  ;;  %2302 = vmatpush3.bf16.msra.mxu1 %v2668_v50  ;;  %v703_v55 = vsel %vm297_vm6, %v702_v42, %v701_v47  ;;  %v805_v56 = vsel %vm297_vm6, %v804_v46, %v803_v52  ;;  %v992_v0 = vld [vmem:[#allocation2 + $0x27] sm:$0x1]  ;;  %v1002_v1 = vrot.slane %v991_v58, 7  ;;  %v888_v3 = vld [vmem:[#allocation2 + $0x6] sm:$0x1]  ;;  %v902_v6 = vrot.slane %v890_v62, 6 }
  0xdd   :  { %2303 = vmatprep.subr.bf16.mxu0 %v2477_v24  ;;  %2315 = vmatprep.subr.bf16.mxu1 %v2477_v24  ;;  %v705_v59 = vsel %vm300_vm7, %v704_v49, %v703_v55  ;;  %v807_v61 = vsel %vm300_vm7, %v806_v53, %v805_v56  ;;  %v990_v4 = vld [vmem:[#allocation2 + $0x7] sm:$0x1]  ;;  %v891_v5 = vld [vmem:[#allocation2 + $0x36] sm:$0x1]  ;;  %v993_v7 = vld [vmem:[#allocation2 + $0x37] sm:$0x1]  ;;  %v901_v11 = vsel %vm288_vm3, %v900_v63, %v888_v3 }
  0xde   :  { %v1004_v9 = vrot.slane %v992_v0, 6  ;;  %v892_v10 = vld [vmem:[#allocation2 + $0x46] sm:$0x1]  ;;  %v994_v12 = vld [vmem:[#allocation2 + $0x47] sm:$0x1]  ;;  %v1003_v14 = vsel %vm288_vm3, %v1002_v1, %v990_v4  ;;  %v904_v13 = vrot.slane %v891_v5, 5 }
  0xdf   :  { %2025 = vmatmul.mubr.msk.f32.vlgmr.msra.gmra.mrb[2].mxu0 %vm252_vm1, %v501_v20  ;;  %2044 = vmatmul.mubr.msk.f32.vlgmr.msra.gmra.mrb[2].mxu1 %vm252_vm1, %v603_v21  ;;  %v1006_v16 = vrot.slane %v993_v7, 5  ;;  %v893_v19 = vld [vmem:[#allocation2 + $0x56] sm:$0x1]  ;;  %v903_v20 = vsel %vm291_vm4, %v902_v6, %v901_v11  ;;  %v906_v21 = vrot.slane %v892_v10, 4  ;;  %v995_v17 = vld [vmem:[#allocation2 + $0x57] sm:$0x1] }
  0xe0   :  { %2305 = vmatpush3.bf16.msra.mxu0 %v2584_v25  ;;  %2317 = vmatpush3.bf16.msra.mxu1 %v2584_v25  ;;  %v1005_v22 = vsel %vm291_vm4, %v1004_v9, %v1003_v14  ;;  %v1008_v23 = vrot.slane %v994_v12, 4  ;;  %v905_v26 = vsel %vm294_vm5, %v904_v13, %v903_v20  ;;  %v908_v27 = vrot.slane %v893_v19, 3 }
  0xe1   :  { %2306 = vmatprep.subr.bf16.mxu0 %v2477_v24  ;;  %2318 = vmatprep.subr.bf16.mxu1 %v2477_v24  ;;  %v1007_v28 = vsel %vm294_vm5, %v1006_v16, %v1005_v22  ;;  %v1010_v29 = vrot.slane %v995_v17, 3  ;;  %v907_v30 = vsel %vm297_vm6, %v906_v21, %v905_v26  ;;  %vm1498_vm3 = vcmask 849600  }
  0xe2   :  { %2062 = vmatprep.mubr.msk.f32.mxu0 %vm2479_vm0, %v2478_v51  ;;  %2081 = vmatprep.mubr.msk.f32.mxu1 %vm2479_vm0, %v2478_v51  ;;  %v1009_v31 = vsel %vm297_vm6, %v1008_v23, %v1007_v28  ;;  %v909_v32 = vsel %vm300_vm7, %v908_v27, %v907_v30  ;;  %vm1600_vm4 = vcmask 915200   ;;  %vm1702_vm5 = vcmask 980800  }
  0xe3   :  { %v1011_v33 = vsel %vm300_vm7, %v1010_v29, %v1009_v31  ;;  %vm1804_vm6 = vcmask 1046400  }
  0xe4   :  { %2308 = vmatpush3.bf16.msra.mxu0 %v2632_v40  ;;  %2320 = vmatpush3.bf16.msra.mxu1 %v2632_v40 }
  0xe5   :  { %2309 = vmatprep.subr.bf16.mxu0 %v2477_v24  ;;  %2321 = vmatprep.subr.bf16.mxu1 %v2477_v24 }
  0xe8   :  { %2311 = vmatpush3.bf16.msra.mxu0 %v2650_v45  ;;  %2323 = vmatpush3.bf16.msra.mxu1 %v2650_v45 }
  0xe9   :  { %2312 = vmatprep.subr.bf16.mxu0 %v2477_v24  ;;  %2324 = vmatprep.subr.bf16.mxu1 %v2477_v24 }
  0xec   :  { %2314 = vmatpush3.bf16.msra.mxu0 %v2668_v50  ;;  %2326 = vmatpush3.bf16.msra.mxu1 %v2668_v50 }
  0xed   :  { %2327 = vmatprep.subr.bf16.mxu0 %v2477_v24  ;;  %2339 = vmatprep.subr.bf16.mxu1 %v2477_v24 }
  0xef   :  { %2063 = vmatmul.mubr.msk.f32.vlgmr.msra.gmra.mrb[4].mxu0 %vm252_vm1, %v705_v59  ;;  %2082 = vmatmul.mubr.msk.f32.vlgmr.msra.gmra.mrb[4].mxu1 %vm252_vm1, %v807_v61 }
  0xf0   :  { %2329 = vmatpush3.bf16.msra.mxu0 %v2584_v25  ;;  %2341 = vmatpush3.bf16.msra.mxu1 %v2584_v25 }
  0xf1   :  { %2330 = vmatprep.subr.bf16.mxu0 %v2477_v24  ;;  %2342 = vmatprep.subr.bf16.mxu1 %v2477_v24 }
  0xf2   :  { %2100 = vmatprep.mubr.msk.f32.mxu0 %vm2479_vm0, %v2478_v51  ;;  %2119 = vmatprep.mubr.msk.f32.mxu1 %vm2479_vm0, %v2478_v51 }
  0xf4   :  { %2332 = vmatpush3.bf16.msra.mxu0 %v2632_v40  ;;  %2344 = vmatpush3.bf16.msra.mxu1 %v2632_v40 }
  0xf5   :  { %2333 = vmatprep.subr.bf16.mxu0 %v2477_v24  ;;  %2345 = vmatprep.subr.bf16.mxu1 %v2477_v24 }
  0xf8   :  { %2335 = vmatpush3.bf16.msra.mxu0 %v2650_v45  ;;  %2347 = vmatpush3.bf16.msra.mxu1 %v2650_v45 }
  0xf9   :  { %2336 = vmatprep.subr.bf16.mxu0 %v2477_v24  ;;  %2348 = vmatprep.subr.bf16.mxu1 %v2477_v24 }
  0xfc   :  { %2338 = vmatpush3.bf16.msra.mxu0 %v2668_v50  ;;  %2350 = vmatpush3.bf16.msra.mxu1 %v2668_v50 }
  0xfd   :  { %2351 = vmatprep.subr.bf16.mxu0 %v2477_v24  ;;  %2363 = vmatprep.subr.bf16.mxu1 %v2477_v24 }
  0xff   :  { %2101 = vmatmul.mubr.msk.f32.vlgmr.msra.gmra.mrb[6].mxu0 %vm252_vm1, %v909_v32  ;;  %2120 = vmatmul.mubr.msk.f32.vlgmr.msra.gmra.mrb[6].mxu1 %vm252_vm1, %v1011_v33 }
 0x100   :  { %2353 = vmatpush3.bf16.msra.mxu0 %v2584_v25  ;;  %2365 = vmatpush3.bf16.msra.mxu1 %v2584_v25 }
 0x101   :  { %2354 = vmatprep.subr.bf16.mxu0 %v2477_v24  ;;  %2366 = vmatprep.subr.bf16.mxu1 %v2477_v24 }
 0x102   :  { %2138 = vmatprep.mubr.msk.f32.mxu0 %vm2479_vm0, %v2478_v51  ;;  %2157 = vmatprep.mubr.msk.f32.mxu1 %vm2479_vm0, %v2478_v51 }
 0x104   :  { %2356 = vmatpush3.bf16.msra.mxu0 %v2632_v40  ;;  %2368 = vmatpush3.bf16.msra.mxu1 %v2632_v40 }
 0x105   :  { %2357 = vmatprep.subr.bf16.mxu0 %v2477_v24  ;;  %2369 = vmatprep.subr.bf16.mxu1 %v2477_v24 }
 0x108   :  { %2359 = vmatpush3.bf16.msra.mxu0 %v2650_v45  ;;  %2371 = vmatpush3.bf16.msra.mxu1 %v2650_v45 }
 0x109   :  { %2360 = vmatprep.subr.bf16.mxu0 %v2477_v24  ;;  %2372 = vmatprep.subr.bf16.mxu1 %v2477_v24 }
 0x10c   :  { %2362 = vmatpush3.bf16.msra.mxu0 %v2668_v50  ;;  %2374 = vmatpush3.bf16.msra.mxu1 %v2668_v50 }
 0x10d   :  { %2375 = vmatprep.subr.bf16.mxu0 %v2477_v24  ;;  %2387 = vmatprep.subr.bf16.mxu1 %v2477_v24 }
 0x10f   :  { %2139 = vmatmul.mubr.msk.f32.vlgmr.msra.gmra.mrb[8].mxu0 %vm252_vm1, %v2795_v48  ;;  %2158 = vmatmul.mubr.msk.f32.vlgmr.msra.gmra.mrb[8].mxu1 %vm252_vm1, %v2800_v57  ;;  %v374_v48 = vld [vmem:[#allocation3] sm:$0x3f] }
 0x110   :  { %2377 = vmatpush3.bf16.msra.mxu0 %v2584_v25  ;;  %2389 = vmatpush3.bf16.msra.mxu1 %v2584_v25 }
 0x111   :  { %2378 = vmatprep.subr.bf16.mxu0 %v2477_v24  ;;  %2390 = vmatprep.subr.bf16.mxu1 %v2477_v24 }
 0x112   :  { %2176 = vmatprep.mubr.msk.f32.mxu0 %vm2479_vm0, %v2478_v51  ;;  %2195 = vmatprep.mubr.msk.f32.mxu1 %vm2479_vm0, %v2478_v51 }
 0x114   :  { %2380 = vmatpush3.bf16.msra.mxu0 %v2632_v40  ;;  %2392 = vmatpush3.bf16.msra.mxu1 %v2632_v40 }
 0x115   :  { %2381 = vmatprep.subr.bf16.mxu0 %v2477_v24  ;;  %2393 = vmatprep.subr.bf16.mxu1 %v2477_v24 }
 0x118   :  { %2383 = vmatpush3.bf16.msra.mxu0 %v2650_v45  ;;  %2395 = vmatpush3.bf16.msra.mxu1 %v2650_v45 }
 0x119   :  { %2384 = vmatprep.subr.bf16.mxu0 %v2477_v24  ;;  %2396 = vmatprep.subr.bf16.mxu1 %v2477_v24 }
 0x11c   :  { %2386 = vmatpush3.bf16.msra.mxu0 %v2668_v50  ;;  %2398 = vmatpush3.bf16.msra.mxu1 %v2668_v50 }
 0x11d   :  { %2399 = vmatprep.subr.bf16.mxu0 %v2477_v24  ;;  %2411 = vmatprep.subr.bf16.mxu1 %v2477_v24 }
 0x11f   :  { %2177 = vmatmul.mubr.msk.f32.vlgmr.msra.gmra.mrb[10].mxu0 %vm252_vm1, %v2807_v60  ;;  %2196 = vmatmul.mubr.msk.f32.vlgmr.msra.gmra.mrb[10].mxu1 %vm252_vm1, %v2814_v2 }
 0x120   :  { %2401 = vmatpush3.bf16.msra.mxu0 %v2584_v25  ;;  %2413 = vmatpush3.bf16.msra.mxu1 %v2584_v25 }
 0x121   :  { %2402 = vmatprep.subr.bf16.mxu0 %v2477_v24  ;;  %2414 = vmatprep.subr.bf16.mxu1 %v2477_v24 }
 0x122   :  { %2214 = vmatprep.mubr.msk.f32.mxu0 %vm2479_vm0, %v2478_v51  ;;  %2233 = vmatprep.mubr.msk.f32.mxu1 %vm2479_vm0, %v2478_v51 }
 0x124   :  { %2404 = vmatpush3.bf16.msra.mxu0 %v2632_v40  ;;  %2416 = vmatpush3.bf16.msra.mxu1 %v2632_v40 }
 0x125   :  { %2405 = vmatprep.subr.bf16.mxu0 %v2477_v24  ;;  %2417 = vmatprep.subr.bf16.mxu1 %v2477_v24 }
 0x128   :  { %2407 = vmatpush3.bf16.msra.mxu0 %v2650_v45  ;;  %2419 = vmatpush3.bf16.msra.mxu1 %v2650_v45 }
 0x129   :  { %2408 = vmatprep.subr.bf16.mxu0 %v2477_v24  ;;  %2420 = vmatprep.subr.bf16.mxu1 %v2477_v24 }
 0x12c   :  { %2410 = vmatpush3.bf16.msra.mxu0 %v2668_v50  ;;  %2422 = vmatpush3.bf16.msra.mxu1 %v2668_v50 }
 0x12d   :  { %2423 = vmatprep.subr.bf16.mxu0 %v2477_v24 }
 0x12f   :  { %2215 = vmatmul.mubr.msk.f32.vlgmr.msra.gmra.mrb[12].mxu0 %vm252_vm1, %v2819_v8  ;;  %2234 = vmatmul.mubr.msk.f32.vlgmr.msra.gmra.mrb[12].mxu1 %vm252_vm1, %v2826_v15 }
 0x130   :  { %2425 = vmatpush3.bf16.msra.mxu0 %v2584_v25  ;;  %2252 = vmatprep.mubr.msk.f32.mxu0 %vm2479_vm0, %v2478_v51  ;;  %vm1192_vm0 = vcmask 652800  }
 0x131   :  { %2426 = vmatprep.subr.bf16.mxu0 %v2477_v24 }
 0x134   :  { %2428 = vmatpush3.bf16.msra.mxu0 %v2632_v40 }
 0x135   :  { %2429 = vmatprep.subr.bf16.mxu0 %v2477_v24 }
 0x138   :  { %2431 = vmatpush3.bf16.msra.mxu0 %v2650_v45 }
 0x139   :  { %2432 = vmatprep.subr.bf16.mxu0 %v2477_v24 }
 0x13c   :  { %2434 = vmatpush3.bf16.msra.mxu0 %v2668_v50 }
 0x13f   :  { %2253 = vmatmul.mubr.msk.f32.vlgmr.msra.gmra.mrb[14].mxu0 %vm252_vm1, %v2833_v18  ;;  %vm1294_vm1 = vcmask 718400  }
 0x1a2   :  { %v370_v25 = vpop.f32.mrb[0].mxu0  ;;  %v468_v57 = vpop.f32.mrb[0].mxu1 }
 0x1a3   :  { %v375_v51 = vadd.f32 %v374_v48, %v370_v25  ;;  %474 = vrot.lane.b32.xlu0 %v468_v57, %s2480_s0  ;;  %v1988_v60 = vpop.f32.mrb[1].mxu0  ;;  %v2007_v40 = vpop.f32.mrb[1].mxu1 }
 0x1a5   :  { %377 = vst.msk [vmem:[#allocation3] sm:$0x3f] %vm376_vm8, %v375_v51 }
 0x1ac   :  { %v472_v59 = vld [vmem:[#allocation3] sm:$0x3f] }
 0x1b2   :  { %v570_v2 = vpop.f32.mrb[2].mxu0  ;;  %v672_v8 = vpop.f32.mrb[2].mxu1 }
 0x1b3   :  { %v2045_v45 = vpop.f32.mrb[3].mxu1  ;;  %576 = vrot.lane.b32.xlu1 %v570_v2, %s2481_s8  ;;  %v2026_v24 = vpop.f32.mrb[3].mxu0 }
 0x1b7   :  { %678 = vrot.lane.b32.xlu1 %v672_v8, %s2482_s9 }
 0x1c2   :  { %v774_v50 = vpop.f32.mrb[4].mxu0  ;;  %v876_v15 = vpop.f32.mrb[4].mxu1 }
 0x1c3   :  { %v2083_v18 = vpop.f32.mrb[5].mxu1  ;;  %780 = vrot.lane.b32.xlu1 %v774_v50, %s2483_s10  ;;  %v2064_v34 = vpop.f32.mrb[5].mxu0 }
 0x1c7   :  { %882 = vrot.lane.b32.xlu1 %v876_v15, %s2484_s11 }
 0x1d2   :  { %v978_v35 = vpop.f32.mrb[6].mxu0  ;;  %v1080_v36 = vpop.f32.mrb[6].mxu1 }
 0x1d3   :  { %v2121_v37 = vpop.f32.mrb[7].mxu1  ;;  %1086 = vrot.lane.b32.xlu1 %v1080_v36, %s2485_s12  ;;  %984 = vrot.lane.b32.xlu0 %v978_v35, %s2486_s13  ;;  %v2102_v38 = vpop.f32.mrb[7].mxu0 }
 0x1e2   :  { %v1182_v39 = vpop.f32.mrb[8].mxu0  ;;  %v1284_v41 = vpop.f32.mrb[8].mxu1 }
 0x1e3   :  { %1290 = vrot.lane.b32.xlu1 %v1284_v41, %s2487_s14  ;;  %v2159_v42 = vpop.f32.mrb[9].mxu1  ;;  %1188 = vrot.lane.b32.xlu0 %v1182_v39, %s2488_s15  ;;  %v2140_v43 = vpop.f32.mrb[9].mxu0 }
 0x1f2   :  { %v1386_v44 = vpop.f32.mrb[10].mxu0  ;;  %v1488_v46 = vpop.f32.mrb[10].mxu1 }
 0x1f3   :  { %1494 = vrot.lane.b32.xlu1 %v1488_v46, %s2489_s16  ;;  %v2197_v47 = vpop.f32.mrb[11].mxu1  ;;  %1392 = vrot.lane.b32.xlu0 %v1386_v44, %s2490_s17  ;;  %v2178_v49 = vpop.f32.mrb[11].mxu0 }
 0x202   :  { %v1590_v52 = vpop.f32.mrb[12].mxu0  ;;  %v1692_v53 = vpop.f32.mrb[12].mxu1 }
 0x203   :  { %1698 = vrot.lane.b32.xlu1 %v1692_v53, %s2491_s1  ;;  %v2235_v55 = vpop.f32.mrb[13].mxu1  ;;  %1596 = vrot.lane.b32.xlu0 %v1590_v52, %s2492_s18  ;;  %v2216_v56 = vpop.f32.mrb[13].mxu0 }
 0x212   :  { %v1794_v54 = vpop.f32.mrb[14].mxu0 }
 0x213   :  { %1800 = vrot.lane.b32.xlu0 %v1794_v54, %s2493_s19  ;;  %v2254_v58 = vpop.f32.mrb[15].mxu0 }
 0x215   :  { %v475_v61 = vpop.permute.xlu0 %474 }
 0x216   :  { %v477_v62 = vadd.f32 %v475_v61, %v472_v59 }
 0x218   :  { %479 = vst.msk [vmem:[#allocation3] sm:$0x3f] %vm478_vm9, %v477_v62 }
 0x21f   :  { %v574_v63 = vld [vmem:[#allocation3] sm:$0x3f] }
 0x225   :  { %v577_v0 = vpop.permute.xlu1 %576 }
 0x226   :  { %v579_v1 = vadd.f32 %v577_v0, %v574_v63 }
 0x228   :  { %581 = vst.msk [vmem:[#allocation3] sm:$0x3f] %vm580_vm10, %v579_v1 }
 0x229   :  { %v679_v3 = vpop.permute.xlu1 %678 }
 0x22f   :  { %v676_v4 = vld [vmem:[#allocation3] sm:$0x3f] }
 0x230   :  { %v681_v5 = vadd.f32 %v679_v3, %v676_v4 }
 0x232   :  { %683 = vst.msk [vmem:[#allocation3] sm:$0x3f] %vm682_vm11, %v681_v5 }
 0x235   :  { %v781_v6 = vpop.permute.xlu1 %780 }
 0x239   :  { %v778_v7 = vld [vmem:[#allocation3] sm:$0x3f]  ;;  %v883_v10 = vpop.permute.xlu1 %882 }
 0x23a   :  { %v783_v9 = vadd.f32 %v781_v6, %v778_v7 }
 0x23c   :  { %785 = vst.msk [vmem:[#allocation3] sm:$0x3f] %vm784_vm12, %v783_v9 }
 0x243   :  { %v880_v11 = vld [vmem:[#allocation3] sm:$0x3f] }
 0x244   :  { %v885_v12 = vadd.f32 %v883_v10, %v880_v11 }
 0x245   :  { %v985_v13 = vpop.permute.xlu0 %984  ;;  %v1087_v19 = vpop.permute.xlu1 %1086 }
 0x246   :  { %887 = vst.msk [vmem:[#allocation3] sm:$0x3f] %vm886_vm13, %v885_v12 }
 0x24d   :  { %v982_v14 = vld [vmem:[#allocation3] sm:$0x3f] }
 0x24e   :  { %v987_v16 = vadd.f32 %v985_v13, %v982_v14 }
 0x250   :  { %989 = vst.msk [vmem:[#allocation3] sm:$0x3f] %vm988_vm14, %v987_v16 }
 0x255   :  { %v1189_v22 = vpop.permute.xlu0 %1188  ;;  %v1291_v26 = vpop.permute.xlu1 %1290 }
 0x257   :  { %v1084_v20 = vld [vmem:[#allocation3] sm:$0x3f] }
 0x258   :  { %v1089_v21 = vadd.f32 %v1087_v19, %v1084_v20 }
 0x25a   :  { %1091 = vst.msk [vmem:[#allocation3] sm:$0x3f] %vm1090_vm15, %v1089_v21 }
 0x261   :  { %v1186_v17 = vld [vmem:[#allocation3] sm:$0x3f] }
 0x262   :  { %v1191_v23 = vadd.f32 %v1189_v22, %v1186_v17 }
 0x264   :  { %1193 = vst.msk [vmem:[#allocation3] sm:$0x3f] %vm1192_vm0, %v1191_v23 }
 0x265   :  { %v1393_v30 = vpop.permute.xlu0 %1392  ;;  %v1495_v32 = vpop.permute.xlu1 %1494 }
 0x26b   :  { %v1288_v27 = vld [vmem:[#allocation3] sm:$0x3f] }
 0x26c   :  { %v1293_v28 = vadd.f32 %v1291_v26, %v1288_v27 }
 0x26e   :  { %1295 = vst.msk [vmem:[#allocation3] sm:$0x3f] %vm1294_vm1, %v1293_v28 }
 0x275   :  { %v1390_v29 = vld [vmem:[#allocation3] sm:$0x3f]  ;;  %v1597_v57 = vpop.permute.xlu0 %1596  ;;  %v1699_v60 = vpop.permute.xlu1 %1698 }
 0x276   :  { %v1395_v31 = vadd.f32 %v1393_v30, %v1390_v29 }
 0x278   :  { %1397 = vst.msk [vmem:[#allocation3] sm:$0x3f] %vm1396_vm2, %v1395_v31 }
 0x27f   :  { %v1492_v33 = vld [vmem:[#allocation3] sm:$0x3f] }
 0x280   :  { %v1497_v48 = vadd.f32 %v1495_v32, %v1492_v33 }
 0x282   :  { %1499 = vst.msk [vmem:[#allocation3] sm:$0x3f] %vm1498_vm3, %v1497_v48 }
 0x285   :  { %v1801_v45 = vpop.permute.xlu0 %1800 }
 0x289   :  { %v1594_v25 = vld [vmem:[#allocation3] sm:$0x3f] }
 0x28a   :  { %v1599_v51 = vadd.f32 %v1597_v57, %v1594_v25 }
 0x28c   :  { %1601 = vst.msk [vmem:[#allocation3] sm:$0x3f] %vm1600_vm4, %v1599_v51 }
 0x293   :  { %v1696_v40 = vld [vmem:[#allocation3] sm:$0x3f] }
 0x294   :  { %v1701_v2 = vadd.f32 %v1699_v60, %v1696_v40 }
 0x296   :  { %1703 = vst.msk [vmem:[#allocation3] sm:$0x3f] %vm1702_vm5, %v1701_v2 }
 0x29d   :  { %v1798_v8 = vld [vmem:[#allocation3] sm:$0x3f] }
 0x29e   :  { %v1803_v24 = vadd.f32 %v1801_v45, %v1798_v8 }
 0x2a0   :  { %1805 = vst.msk [vmem:[#allocation3] sm:$0x3f] %vm1804_vm6, %v1803_v24 }
 0x2a1   :  { %2464 = shalt.err (!%p2461_p4)
}
 0x2a2   :  { %s2465_s25 = scalar_lea.hbm %s3001_s2, 128 }
 0x2a3   :  { %p2466_p5 = scmp.ne.s32.totalorder %s3001_s2, %s2465_s25  ;;  %p2469_p6 = scmp.lt.u32.totalorder %s2465_s25, %s3001_s2 }
 0x2a5   :  { %p2471_p7 = pnand %p2469_p6, %p2466_p5 }
 0x2a7   :  { %2474 = shalt.err (!%p2471_p7)
}
 0x2a8   :  { %1815 = dma.vmem_to_hbm [thread:$0]  %s1813_s21, 128, %s3001_s2, [#allocation4]  }
 0x2a9   :  { %2475 = dma.done.wait [#allocation4], 128  }
 0x2aa   :  { %2476 = vsyncadd [#allocation4], 4294967168 }
 0x2ab   :  { %1819 = vsyncpa [#allocation4], 1 }

// kernel: _wav_decoder_fallback_4d.1
= control target key start
LH: loop header
LB: loop body
LE: loop exit
PB: predicated region body
PF: predicated region fallthrough
CT: control target
= control target key end

     0   :  { %s406_s9 = smov 0   ;;  %s450_s0 = inlined_call_operand.vmem [shape: f32[6,15,64], index: 0, kind: input, shape index: {}]   ;;  %s451_s1 = inlined_call_operand.vmem [shape: f32[64,16], index: 1, kind: input, shape index: {}]   ;;  %s452_s2 = inlined_call_operand.vmem [shape: f32[6,16,8], index: 2, kind: output, shape index: {}]  }
   0x1 LB: > { %s313_s10 = sadd.s32 4294967295, %s388_s9   ;;  %p317_p0 = scmp.ge.s32.totalorder %s388_s9, 1  ;;  %s388_s9 = sphi %s406_s9, %s12_s9  }
   0x2   : > { %p112_p1 = scmp.lt.s32.totalorder %s388_s9, 7 }
   0x4   : > { %p113_p2 = pnand %p317_p0, %p112_p1 }
   0x5   : > { %v146_v0 = vld [vmem:[%s451_s1] sm:$0xff] (!%p113_p2)  ;;  %v147_v1 = vld [vmem:[%s451_s1 + $0x8] sm:$0xff] (!%p113_p2)  ;;  %v148_v2 = vld [vmem:[%s451_s1 + $0x10] sm:$0xff] (!%p113_p2)  ;;  %p134_p3 = scmp.lt.s32.totalorder (!%p113_p2), %s313_s10, 5  ;;  %vm154_vm0 = vcmask (!%p113_p2), 523264   ;;  %vm242_vm1 = vcmask (!%p113_p2), 1040384  }
   0x6   : > { %116 = sbr.rel (%p113_p2) target bundleno = 361 (0x169), region = 28  ;;  %v357_v3 = vpack.c.bf16 (!%p113_p2), %v147_v1, %v146_v0  ;;  %v149_v4 = vld [vmem:[%s451_s1 + $0x18] sm:$0xff] (!%p113_p2)  ;;  %v150_v6 = vld [vmem:[%s451_s1 + $0x20] sm:$0xff] (!%p113_p2)  ;;  %v151_v7 = vld [vmem:[%s451_s1 + $0x28] sm:$0xff] (!%p113_p2)  ;;  %s390_s3 = smov (!%p113_p2), 120   ;;  %vm255_vm2 = vcmask (!%p113_p2), 64512  }
   0x7   : > { %v361_v5 = vpack.c.bf16 (!%p113_p2), %v149_v4, %v148_v2  ;;  %v365_v8 = vpack.c.bf16 (!%p113_p2), %v151_v7, %v150_v6  ;;  %v152_v9 = vld [vmem:[%s451_s1 + $0x30] sm:$0xff] (!%p113_p2)  ;;  %v153_v10 = vld [vmem:[%s451_s1 + $0x38] sm:$0xff] (!%p113_p2)  ;;  %vm236_vm3 = vcmask (!%p113_p2), 1046528  }
   0x8   : > { %358 = vmatprep.subr.bf16.mxu0 (!%p113_p2), %v357_v3  ;;  %v369_v12 = vpack.c.bf16 (!%p113_p2), %v153_v10, %v152_v9 }
   0x9   : > { %360 = vmatpush3.bf16.msra.mxu0 (!%p113_p2), %v357_v3 }
   0xa   : > { %362 = vmatprep.subr.bf16.mxu0 (!%p113_p2), %v361_v5 }
   0xd   : > { %s454_s10 = smov (!%p134_p3, %s313_s10), 5  ;;  %364 = vmatpush3.bf16.msra.mxu0 %v361_v5 }
   0xe   : > { %s326_s23 = sshll.u32 %s454_s10, 4  ;;  %366 = vmatprep.subr.bf16.mxu0 %v365_v8 }
   0xf   : > { %s138_s26 = scalar_lea.vmem %s450_s0, %s326_s23  ;;  %s143_s6 = scalar_lea.vmem %s452_s2, %s326_s23 }
  0x10   : > { %v144_v11 = vld [vmem:[%s138_s26] sm:$0xff]  ;;  %v145_v13 = vld [vmem:[%s138_s26 + $0x8] sm:$0x7f] }
  0x11   : > { %354 = vmatprep.mubr.msk.f32.mxu0 %vm154_vm0, %v144_v11  ;;  %368 = vmatpush3.bf16.msra.mxu0 %v365_v8 }
  0x12   : > { %370 = vmatprep.subr.bf16.mxu0 %v369_v12 }
  0x15   : > { %372 = vmatpush3.bf16.msra.mxu0 %v369_v12 }
  0x18   : > { %355 = vmatmul.mubr.msk.f32.vlgmr.msra.gmra.mrb[0].mxu0 %vm154_vm0, %v145_v13 }
  0xeb   : > { %v356_v14 = vpop.f32.mrb[0].mxu0 }
  0xec   : > { %v244_v15 = vrot.slane %v356_v14, 7  ;;  %v227_v16 = vpop.f32.mrb[1].mxu0  ;;  %v237_v22 = vsel %vm236_vm3, %v356_v14, 0.0 }
  0xed   : > { %v243_v17 = vrot.slane %v227_v16, 7 }
  0xef   : > { %246 = vrot.lane.b32.xlu0 %v243_v17, %s390_s3  ;;  %v245_v18 = vsel %vm242_vm1, %v243_v17, %v244_v15 }
  0xf3   : > { %248 = vrot.lane.b32.xlu0 %v245_v18, %s390_s3 }
 0x161   : > { %v247_v19 = vpop.permute.xlu0 %246 }
 0x162   : > { %v252_v20 = vsel %vm242_vm1, 0.0, %v247_v19 }
 0x163   : > { %v253_v21 = vadd.f32 %v252_v20, %v227_v16 }
 0x165   : > { %256 = vst.msk [vmem:[%s143_s6] sm:$0xff] %vm255_vm2, %v253_v21  ;;  %v249_v23 = vpop.permute.xlu0 %248 }
 0x166   : > { %v254_v24 = vadd.f32 %v249_v23, %v237_v22 }
 0x168   : > { %257 = vst.msk [vmem:[%s143_s6 + $0x8] sm:$0xff] %vm255_vm2, %v254_v24 }
 0x169 PF: > { %s12_s9 = sadd.s32 1, %s388_s9  }
 0x16a   : > { %p9_p4 = scmp.ge.s32.totalorder %s12_s9, 8  }
 0x16c   :  { %11 = sbr.rel (!%p9_p4) target bundleno = 1 (0x1), region = 58 }

</bundles_post_ra>
